<compile_context>
chip_gen: v6e
topology: v6e:2x2x1
jax: 0.10.0
libtpu: 0.0.40
codegen_flags: <defaults>
</compile_context>

<pallas_src>
import math

import jax
import jax.numpy as jnp
import numpy as np
from jax.experimental import pallas as pl
from jax.experimental.pallas import tpu as pltpu

D_MODEL = 512     # configs.d_model (Attention.W is hard-coded (512, hid_dim))
HID = 512         # Attention(512) hidden dim
N_ATTN = 24       # len(self.attentions)
C_OUT = 131       # fore_op_calc = nn.Linear(512, 131)
C_PAD = 256       # C_OUT padded to a multiple of 128 lanes (dense stores)
MASK_VALUE = -1e30
HEADS_PER_BLOCK = 2   # grid=(2,) at pred_len=4: megacore + DMA/compute overlap


def _attention_head_block_kernel(xf_ref, xb_ref, W_ref, b_ref, u_ref,
                                 Wf_ref, bf_ref, out_ref):
    """One grid step == HEADS_PER_BLOCK Attention heads + fore_op_calc.

    xf_ref : (B, L, D)         f32 encoder output (resident across steps)
    xb_ref : (B*L, D)          bf16 encoder output, pre-cast in the wrapper
    W_ref  : (1, D, HB*HID)    bf16 per-block weights (heads concat on lanes)
    b_ref  : (1, 1, HB*HID)    f32 per-block bias
    u_ref  : (1, 1, HB*HID)    f32 per-block scoring vectors (u^T per head)
    Wf_ref : (D, C_PAD)        f32 fore_op_calc weight, zero-padded 131->256
    bf_ref : (1, C_PAD)        f32 fore_op_calc bias,   zero-padded 131->256
    out_ref: (1, HB*B, C_PAD)  f32 per-head / per-batch fore_op_calc outputs
    """
    B, L, D = xf_ref.shape
    HBH = W_ref.shape[2]
    HB = HBH // HID

    x = xf_ref[...]                                      # (B, L, D)   f32
    xb = xb_ref[...]                                     # (B*L, D)    bf16

    # One wide MXU matmul for all HB heads: bf16 inputs, f32 accumulation.
    hpre = jnp.dot(xb, W_ref[0], preferred_element_type=jnp.float32) + b_ref[0]
    hact = jnp.tanh(hpre).reshape(B, L, HBH)             # (B, L, HB*HID) f32
    prod = hact * u_ref[...]                             # pre-reduced scores

    fused_rows = []
    for h in range(HB):                                  # static unroll, HB=2
        # scores_h = tanh(x W_h + b_h) @ u_h -> (B, L); 512-lane static slice.
        scores = jnp.sum(prod[:, :, h * HID:(h + 1) * HID], axis=-1)

        # mask is torch.ones(B, L) in the module forward, so
        # `mask*s + (1-mask)*mask_value` is an exact no-op and is dropped.
        # Softmax over the sequence dim (dim=-2 of the (B, L, 1) tensor).
        m = jnp.max(scores, axis=-1, keepdims=True)
        e = jnp.exp(scores - m)
        denom = jnp.sum(e, axis=-1, keepdims=True)
        attn = e * pl.reciprocal(denom, approx=True)      # (B, L)

        # attn^T @ x -> pooled embedding (B, D).  Note: zero-padded heads give
        # a uniform softmax (denom = L, no NaN) and are sliced off afterwards.
        fused_rows.append(jnp.sum(attn[:, :, None] * x, axis=1))

    fused = jnp.concatenate(fused_rows, axis=0)           # (HB*B, D) f32

    # fore_op_calc fused in (f32 matmul, tiny M); pad lanes [131:256) are 0.
    y = jnp.dot(fused, Wf_ref[...], preferred_element_type=jnp.float32)
    out_ref[0] = y + bf_ref[...]


def attention_fore_blocks(enc_out, enc_out_bf16, W_blk, b_blk, u_blk,
                          Wf_pad, bf_pad):
    """(n_blocks, HB*B, C_PAD) fore_op_calc outputs for the streamed heads."""
    B, L, D = enc_out.shape
    n_blocks, _, HBH = W_blk.shape
    HB = HBH // HID
    return pl.pallas_call(
        _attention_head_block_kernel,
        out_shape=jax.ShapeDtypeStruct((n_blocks, HB * B, C_PAD), jnp.float32),
        grid=(n_blocks,),
        in_specs=[
            pl.BlockSpec((B, L, D), lambda g: (0, 0, 0)),     # enc_out f32 (resident)
            pl.BlockSpec((B * L, D), lambda g: (0, 0)),       # enc_out bf16 (resident)
            pl.BlockSpec((1, D, HBH), lambda g: (g, 0, 0)),   # W block (streamed, pipelined)
            pl.BlockSpec((1, 1, HBH), lambda g: (g, 0, 0)),   # b block
            pl.BlockSpec((1, 1, HBH), lambda g: (g, 0, 0)),   # u block
            pl.BlockSpec((D, C_PAD), lambda g: (0, 0)),       # fore_op_calc W (resident)
            pl.BlockSpec((1, C_PAD), lambda g: (0, 0)),       # fore_op_calc b (resident)
        ],
        out_specs=pl.BlockSpec((1, HB * B, C_PAD), lambda g: (g, 0, 0)),
        compiler_params=pltpu.CompilerParams(
            dimension_semantics=("parallel",)),
    )(enc_out, enc_out_bf16, W_blk, b_blk, u_blk, Wf_pad, bf_pad)


def _xavier_uniform(key, shape, fan_in, fan_out):
    limit = math.sqrt(6.0 / (fan_in + fan_out))
    return jax.random.uniform(key, shape, jnp.float32, -limit, limit)


class InformerDMSPallas:
    """Deterministically initialized parameters + forward pass."""

    def __init__(self, key, enc_in, mark_in, pred_len):
        self.pred_len = pred_len
        ks = jax.random.split(key, 6)

        # 24 Attention heads: W (512, 512) xavier, b zeros, u (512, 1) xavier.
        self.W_all = _xavier_uniform(ks[0], (N_ATTN, D_MODEL, HID), D_MODEL, HID)
        self.b_all = jnp.zeros((N_ATTN, 1, HID), jnp.float32)
        self.u_all = _xavier_uniform(ks[1], (N_ATTN, 1, HID), HID, 1)

        # fore_op_calc = nn.Linear(512, 131); weight stored transposed (512, 131).
        k = 1.0 / math.sqrt(D_MODEL)
        self.Wf = jax.random.uniform(ks[2], (D_MODEL, C_OUT), jnp.float32, -k, k)
        self.bf = jax.random.uniform(ks[3], (1, C_OUT), jnp.float32, -k, k)

        # TODO(synk): DataEmbedding / ProbSparse-attention Encoder sources are not
        # provided with the module; use a deterministic linear value+temporal
        # embedding stand-in and an identity encoder to produce enc_out (B, L, 512).
        self.Wv = 0.02 * jax.random.normal(ks[4], (enc_in, D_MODEL), jnp.float32)
        self.Wm = 0.02 * jax.random.normal(ks[5], (mark_in, D_MODEL), jnp.float32)

        # --- Pallas-side prepared weights -------------------------------------
        # Only the last pred_len heads survive dec_out[:, -pred_len:, :]; stream
        # only those.  Pad the head count up to a multiple of HEADS_PER_BLOCK
        # with zero heads (uniform softmax, no NaN), discarded afterwards.
        self.n_heads_used = min(pred_len, N_ATTN)
        start = N_ATTN - self.n_heads_used
        hb = min(HEADS_PER_BLOCK, self.n_heads_used)
        self.heads_per_block = hb
        self.n_blocks = -(-self.n_heads_used // hb)
        n_pad = self.n_blocks * hb - self.n_heads_used

        W_used = self.W_all[start:]
        b_used = self.b_all[start:]
        u_used = self.u_all[start:]
        if n_pad:
            W_used = jnp.concatenate(
                [W_used, jnp.zeros((n_pad, D_MODEL, HID), jnp.float32)], axis=0)
            b_used = jnp.concatenate(
                [b_used, jnp.zeros((n_pad, 1, HID), jnp.float32)], axis=0)
            u_used = jnp.concatenate(
                [u_used, jnp.zeros((n_pad, 1, HID), jnp.float32)], axis=0)

        # Heads concatenated along the output/lane dim within each block so the
        # kernel can issue one wide matmul per grid step.
        W_blk = jnp.transpose(
            W_used.reshape(self.n_blocks, hb, D_MODEL, HID),
            (0, 2, 1, 3)).reshape(self.n_blocks, D_MODEL, hb * HID)
        b_blk = b_used.reshape(self.n_blocks, 1, hb * HID)
        u_blk = u_used.reshape(self.n_blocks, 1, hb * HID)

        # Weights streamed to the MXU live in HBM as bf16 (halves DMA bytes);
        # bias / scoring vector stay f32 (tiny, f32 VPU path).
        # TODO(synk): optional int8 (v5e/v6e) or fp8 (v7x) weight streaming
        # would halve DMA again; bf16 is kept as the portable default.
        self.W_blk = W_blk.astype(jnp.bfloat16)
        self.b_blk = b_blk
        self.u_blk = u_blk

        # fore_op_calc weight/bias zero-padded to 256 lanes; pad output == 0.
        self.Wf_pad = jnp.zeros((D_MODEL, C_PAD), jnp.float32).at[:, :C_OUT].set(self.Wf)
        self.bf_pad = jnp.zeros((1, C_PAD), jnp.float32).at[:, :C_OUT].set(self.bf)

        # Whole forward (embedding + kernel + slice/transpose) as ONE jit to
        # avoid per-op dispatch overhead around the microsecond-scale kernel.
        self._forward = jax.jit(self._forward_impl)

    def _enc_embed_and_encode(self, x_enc, x_mark_enc):
        # stand-in for self.enc_embedding(...) + self.encoder(...)
        return (jnp.einsum("blc,cd->bld", x_enc, self.Wv) +
                jnp.einsum("blc,cd->bld", x_mark_enc, self.Wm))

    def _forward_impl(self, x_enc, x_mark_enc):
        enc_out = self._enc_embed_and_encode(x_enc, x_mark_enc)   # (B, L, 512)
        B, L, D = enc_out.shape
        enc_bf = enc_out.reshape(B * L, D).astype(jnp.bfloat16)   # cast once

        out = attention_fore_blocks(enc_out, enc_bf, self.W_blk, self.b_blk,
                                    self.u_blk, self.Wf_pad, self.bf_pad)
        # (n_blocks, hb*B, C_PAD) -> (heads, B, C_OUT): drop pad heads / lanes.
        out = out.reshape(self.n_blocks * self.heads_per_block, B, C_PAD)
        out = out[:self.n_heads_used, :, :C_OUT]
        return jnp.transpose(out, (1, 0, 2))     # == dec_out[:, -pred_len:, :]

    def __call__(self, x_enc, x_mark_enc, x_dec=None, x_mark_dec=None):
        # Decoder inputs are accepted for signature fidelity but (as in the
        # reference forward) never used.
        return self._forward(x_enc, x_mark_enc)

    # pure-JAX reference for the Pallas-implemented hot path (sanity check):
    # full 24-head f32 computation, then the module's trailing slice.
    def reference(self, x_enc, x_mark_enc):
        enc_out = self._enc_embed_and_encode(x_enc, x_mark_enc)
        B, L, _ = enc_out.shape
        mask = jnp.ones((B, L, 1), jnp.float32)
        outs = []
        for h in range(N_ATTN):
            s = jnp.tanh(enc_out @ self.W_all[h] + self.b_all[h, 0])      # (B, L, 512)
            s = jnp.einsum("bld,d->bl", s, self.u_all[h, 0])[..., None]   # (B, L, 1)
            s = mask * s + (1.0 - mask) * MASK_VALUE
            w = jax.nn.softmax(s, axis=-2)
            fused = jnp.einsum("blo,bld->bd", w, enc_out)                 # (B, 512)
            outs.append(fused @ self.Wf + self.bf[0])
        dec_out = jnp.stack(outs, axis=1)                                 # (B, 24, 131)
        return dec_out[:, -self.pred_len:, :]


if __name__ == "__main__":
    key = jax.random.PRNGKey(0)
    k_model, k1, k2, k3, k4 = jax.random.split(key, 5)

    B, L_enc, L_dec = 2, 16, 8
    ENC_IN, MARK_IN = 7, 4
    PRED_LEN = 4

    model = InformerDMSPallas(k_model, enc_in=ENC_IN, mark_in=MARK_IN,
                              pred_len=PRED_LEN)

    x_enc = jax.random.normal(k1, (B, L_enc, ENC_IN), jnp.float32)
    x_mark_enc = jax.random.normal(k2, (B, L_enc, MARK_IN), jnp.float32)
    x_dec = jax.random.normal(k3, (B, L_dec, ENC_IN), jnp.float32)        # unused
    x_mark_dec = jax.random.normal(k4, (B, L_dec, MARK_IN), jnp.float32)  # unused

    out = model(x_enc, x_mark_enc, x_dec, x_mark_dec)
    out = jax.block_until_ready(out)

    assert out.shape == (B, PRED_LEN, C_OUT), out.shape

    ref = jax.block_until_ready(model.reference(x_enc, x_mark_enc))
    np.testing.assert_allclose(np.asarray(out), np.asarray(ref),
                               rtol=1e-2, atol=1e-2)

    print("KERNEL_OK")
</pallas_src>

<mosaic_0001>
module attributes {stable_mosaic.version = 11 : i64} {
  func.func @_attention_head_block_kernel(%arg0: i32, %arg1: memref<2x16x512xf32, #tpu.memory_space<vmem>>, %arg2: memref<32x512xbf16, #tpu.memory_space<vmem>>, %arg3: memref<1x512x1024xbf16, #tpu.memory_space<vmem>>, %arg4: memref<1x1x1024xf32, #tpu.memory_space<vmem>>, %arg5: memref<1x1x1024xf32, #tpu.memory_space<vmem>>, %arg6: memref<512x256xf32, #tpu.memory_space<vmem>>, %arg7: memref<1x256xf32, #tpu.memory_space<vmem>>, %arg8: memref<1x4x256xf32, #tpu.memory_space<vmem>>) attributes {dimension_semantics = [#tpu.dimension_semantics<parallel>], iteration_bounds = array<i64: 2>, scalar_prefetch = 0 : i64, scratch_operands = 0 : i64, tpu.core_type = #tpu.core_type<tc>, window_params = [{pipeline_mode = #tpu.pipeline_mode<synchronous>, transform_indices = @transform_0, window_bounds = array<i64: 2, 16, 512>}, {pipeline_mode = #tpu.pipeline_mode<synchronous>, transform_indices = @transform_1, window_bounds = array<i64: 32, 512>}, {transform_indices = @transform_2, window_bounds = array<i64: 1, 512, 1024>}, {transform_indices = @transform_3, window_bounds = array<i64: 1, 1, 1024>}, {transform_indices = @transform_4, window_bounds = array<i64: 1, 1, 1024>}, {pipeline_mode = #tpu.pipeline_mode<synchronous>, transform_indices = @transform_5, window_bounds = array<i64: 512, 256>}, {pipeline_mode = #tpu.pipeline_mode<synchronous>, transform_indices = @transform_6, window_bounds = array<i64: 1, 256>}, {transform_indices = @transform_7, window_bounds = array<i64: 1, 4, 256>}]} {
    %c0 = arith.constant 0 : index
    %c0_0 = arith.constant 0 : index
    %c0_1 = arith.constant 0 : index
    %0 = vector.load %arg1[%c0, %c0_0, %c0_1] : memref<2x16x512xf32, #tpu.memory_space<vmem>>, vector<2x16x512xf32>
    %c0_2 = arith.constant 0 : index
    %c0_3 = arith.constant 0 : index
    %1 = vector.load %arg2[%c0_2, %c0_3] : memref<32x512xbf16, #tpu.memory_space<vmem>>, vector<32x512xbf16>
    %c0_4 = arith.constant 0 : index
    %c0_5 = arith.constant 0 : index
    %c0_6 = arith.constant 0 : index
    %2 = vector.load %arg3[%c0_4, %c0_5, %c0_6] : memref<1x512x1024xbf16, #tpu.memory_space<vmem>>, vector<1x512x1024xbf16>
    %3 = vector.shape_cast %2 : vector<1x512x1024xbf16> to vector<512x1024xbf16>
    %cst = arith.constant dense<0.000000e+00> : vector<32x1024xf32>
    %4 = tpu.matmul %1, %3, %cst {dimension_numbers = #tpu.dot_dimension_numbers<[1], [0], [0], [1], [0, 0, 1, 1], [], []>} : vector<32x512xbf16>, vector<512x1024xbf16>, vector<32x1024xf32> -> vector<32x1024xf32>
    %c0_7 = arith.constant 0 : index
    %c0_8 = arith.constant 0 : index
    %c0_9 = arith.constant 0 : index
    %5 = vector.load %arg4[%c0_7, %c0_8, %c0_9] : memref<1x1x1024xf32, #tpu.memory_space<vmem>>, vector<1x1x1024xf32>
    %6 = vector.shape_cast %5 : vector<1x1x1024xf32> to vector<1x1024xf32>
    %7 = vector.broadcast %6 : vector<1x1024xf32> to vector<32x1024xf32>
    %8 = arith.addf %4, %7 : vector<32x1024xf32>
    %9 = math.tanh %8 : vector<32x1024xf32>
    %10 = vector.shape_cast %9 : vector<32x1024xf32> to vector<2x16x1024xf32>
    %c0_10 = arith.constant 0 : index
    %c0_11 = arith.constant 0 : index
    %c0_12 = arith.constant 0 : index
    %11 = vector.load %arg5[%c0_10, %c0_11, %c0_12] : memref<1x1x1024xf32, #tpu.memory_space<vmem>>, vector<1x1x1024xf32>
    %12 = vector.broadcast %11 : vector<1x1x1024xf32> to vector<2x16x1024xf32>
    %13 = arith.mulf %10, %12 : vector<2x16x1024xf32>
    %14 = vector.extract_strided_slice %13 {offsets = [0, 0, 0], sizes = [2, 16, 512], strides = [1, 1, 1]} : vector<2x16x1024xf32> to vector<2x16x512xf32>
    %cst_13 = arith.constant dense<0.000000e+00> : vector<2x16xf32>
    %15 = vector.multi_reduction <add>, %14, %cst_13 [2] : vector<2x16x512xf32> to vector<2x16xf32>
    %cst_14 = arith.constant dense<0xFF800000> : vector<2xf32>
    %16 = vector.multi_reduction <maximumf>, %15, %cst_14 [1] : vector<2x16xf32> to vector<2xf32>
    %17 = vector.shape_cast %16 : vector<2xf32> to vector<2x1xf32>
    %18 = vector.broadcast %17 : vector<2x1xf32> to vector<2x16xf32>
    %19 = arith.subf %15, %18 : vector<2x16xf32>
    %20 = math.exp %19 : vector<2x16xf32>
    %cst_15 = arith.constant dense<0.000000e+00> : vector<2xf32>
    %21 = vector.multi_reduction <add>, %20, %cst_15 [1] : vector<2x16xf32> to vector<2xf32>
    %22 = vector.shape_cast %21 : vector<2xf32> to vector<2x1xf32>
    %23 = tpu.reciprocal %22 {approx = true} : vector<2x1xf32> -> vector<2x1xf32>
    %24 = vector.broadcast %23 : vector<2x1xf32> to vector<2x16xf32>
    %25 = arith.mulf %20, %24 : vector<2x16xf32>
    %26 = vector.shape_cast %25 : vector<2x16xf32> to vector<2x16x1xf32>
    %27 = vector.broadcast %26 : vector<2x16x1xf32> to vector<2x16x512xf32>
    %28 = arith.mulf %27, %0 : vector<2x16x512xf32>
    %cst_16 = arith.constant dense<0.000000e+00> : vector<2x512xf32>
    %29 = vector.multi_reduction <add>, %28, %cst_16 [1] : vector<2x16x512xf32> to vector<2x512xf32>
    %30 = vector.extract_strided_slice %13 {offsets = [0, 0, 512], sizes = [2, 16, 512], strides = [1, 1, 1]} : vector<2x16x1024xf32> to vector<2x16x512xf32>
    %cst_17 = arith.constant dense<0.000000e+00> : vector<2x16xf32>
    %31 = vector.multi_reduction <add>, %30, %cst_17 [2] : vector<2x16x512xf32> to vector<2x16xf32>
    %cst_18 = arith.constant dense<0xFF800000> : vector<2xf32>
    %32 = vector.multi_reduction <maximumf>, %31, %cst_18 [1] : vector<2x16xf32> to vector<2xf32>
    %33 = vector.shape_cast %32 : vector<2xf32> to vector<2x1xf32>
    %34 = vector.broadcast %33 : vector<2x1xf32> to vector<2x16xf32>
    %35 = arith.subf %31, %34 : vector<2x16xf32>
    %36 = math.exp %35 : vector<2x16xf32>
    %cst_19 = arith.constant dense<0.000000e+00> : vector<2xf32>
    %37 = vector.multi_reduction <add>, %36, %cst_19 [1] : vector<2x16xf32> to vector<2xf32>
    %38 = vector.shape_cast %37 : vector<2xf32> to vector<2x1xf32>
    %39 = tpu.reciprocal %38 {approx = true} : vector<2x1xf32> -> vector<2x1xf32>
    %40 = vector.broadcast %39 : vector<2x1xf32> to vector<2x16xf32>
    %41 = arith.mulf %36, %40 : vector<2x16xf32>
    %42 = vector.shape_cast %41 : vector<2x16xf32> to vector<2x16x1xf32>
    %43 = vector.broadcast %42 : vector<2x16x1xf32> to vector<2x16x512xf32>
    %44 = arith.mulf %43, %0 : vector<2x16x512xf32>
    %cst_20 = arith.constant dense<0.000000e+00> : vector<2x512xf32>
    %45 = vector.multi_reduction <add>, %44, %cst_20 [1] : vector<2x16x512xf32> to vector<2x512xf32>
    %46 = tpu.concatenate %29, %45 in 0 : vector<2x512xf32>, vector<2x512xf32> -> vector<4x512xf32>
    %c0_21 = arith.constant 0 : index
    %c0_22 = arith.constant 0 : index
    %47 = vector.load %arg6[%c0_21, %c0_22] : memref<512x256xf32, #tpu.memory_space<vmem>>, vector<512x256xf32>
    %cst_23 = arith.constant dense<0.000000e+00> : vector<4x256xf32>
    %48 = tpu.matmul %46, %47, %cst_23 {dimension_numbers = #tpu.dot_dimension_numbers<[1], [0], [0], [1], [0, 0, 1, 1], [], []>} : vector<4x512xf32>, vector<512x256xf32>, vector<4x256xf32> -> vector<4x256xf32>
    %c0_24 = arith.constant 0 : index
    %c0_25 = arith.constant 0 : index
    %49 = vector.load %arg7[%c0_24, %c0_25] : memref<1x256xf32, #tpu.memory_space<vmem>>, vector<1x256xf32>
    %50 = vector.broadcast %49 : vector<1x256xf32> to vector<4x256xf32>
    %51 = arith.addf %48, %50 : vector<4x256xf32>
    %c0_26 = arith.constant 0 : index
    %c0_27 = arith.constant 0 : index
    %c0_28 = arith.constant 0 : index
    %52 = vector.load %arg8[%c0_26, %c0_27, %c0_28] : memref<1x4x256xf32, #tpu.memory_space<vmem>>, vector<1x4x256xf32>
    %53 = vector.shape_cast %52 : vector<1x4x256xf32> to vector<4x256xf32>
    %54 = vector.shape_cast %51 : vector<4x256xf32> to vector<1x4x256xf32>
    tpu.vector_store %arg8[%c0_26, %c0_27, %c0_28], %54 {strides = array<i32>} : memref<1x4x256xf32, #tpu.memory_space<vmem>>, vector<1x4x256xf32>,
    return
  }
  func.func @transform_0(%arg0: i32) -> (i32, i32, i32) {
    %c0_i32 = arith.constant 0 : i32
    %c0_i32_0 = arith.constant 0 : i32
    %c0_i32_1 = arith.constant 0 : i32
    %c0_i32_2 = arith.constant 0 : i32
    return %c0_i32, %c0_i32_0, %c0_i32_1 : i32, i32, i32
  }
  func.func @transform_1(%arg0: i32) -> (i32, i32) {
    %c0_i32 = arith.constant 0 : i32
    %c0_i32_0 = arith.constant 0 : i32
    %c0_i32_1 = arith.constant 0 : i32
    return %c0_i32, %c0_i32_0 : i32, i32
  }
  func.func @transform_2(%arg0: i32) -> (i32, i32, i32) {
    %c0_i32 = arith.constant 0 : i32
    %c0_i32_0 = arith.constant 0 : i32
    %c0_i32_1 = arith.constant 0 : i32
    return %arg0, %c0_i32, %c0_i32_0 : i32, i32, i32
  }
  func.func @transform_3(%arg0: i32) -> (i32, i32, i32) {
    %c0_i32 = arith.constant 0 : i32
    %c0_i32_0 = arith.constant 0 : i32
    %c0_i32_1 = arith.constant 0 : i32
    return %arg0, %c0_i32, %c0_i32_0 : i32, i32, i32
  }
  func.func @transform_4(%arg0: i32) -> (i32, i32, i32) {
    %c0_i32 = arith.constant 0 : i32
    %c0_i32_0 = arith.constant 0 : i32
    %c0_i32_1 = arith.constant 0 : i32
    return %arg0, %c0_i32, %c0_i32_0 : i32, i32, i32
  }
  func.func @transform_5(%arg0: i32) -> (i32, i32) {
    %c0_i32 = arith.constant 0 : i32
    %c0_i32_0 = arith.constant 0 : i32
    %c0_i32_1 = arith.constant 0 : i32
    return %c0_i32, %c0_i32_0 : i32, i32
  }
  func.func @transform_6(%arg0: i32) -> (i32, i32) {
    %c0_i32 = arith.constant 0 : i32
    %c0_i32_0 = arith.constant 0 : i32
    %c0_i32_1 = arith.constant 0 : i32
    return %c0_i32, %c0_i32_0 : i32, i32
  }
  func.func @transform_7(%arg0: i32) -> (i32, i32, i32) {
    %c0_i32 = arith.constant 0 : i32
    %c0_i32_0 = arith.constant 0 : i32
    %c0_i32_1 = arith.constant 0 : i32
    return %arg0, %c0_i32, %c0_i32_0 : i32, i32, i32
  }
}

</mosaic_0001>

<bundles_post_ra>
// kernel: _forward_impl.1
= control target key start
LH: loop header
LB: loop body
LE: loop exit
PB: predicated region body
PF: predicated region fallthrough
CT: control target
= control target key end

     0   :  { %s4914_s0 = inlined_call_operand.vmem [shape: f32[2,16,512], index: 0, kind: input, shape index: {}]   ;;  %s4915_s1 = inlined_call_operand.vmem [shape: bf16[32,512], index: 1, kind: input, shape index: {}]   ;;  %s4916_s2 = inlined_call_operand.hbm [shape: bf16[2,512,1024], index: 2, kind: input, shape index: {}]   ;;  %s4917_s3 = inlined_call_operand.vmem [shape: f32[2,1,1024], index: 3, kind: input, shape index: {}]   ;;  %s4918_s4 = inlined_call_operand.hbm [shape: f32[2,1,1024], index: 4, kind: input, shape index: {}]   ;;  %s4919_s5 = inlined_call_operand.hbm [shape: f32[512,256], index: 5, kind: input, shape index: {}]   ;;  %s4920_s6 = inlined_call_operand.hbm [shape: f32[1,256], index: 6, kind: input, shape index: {}]   ;;  %s4921_s7 = inlined_call_operand.vmem [shape: f32[2,4,256], index: 7, kind: output, shape index: {}]  }
   0x1   :  { %4925 = sst [smem:[#allocation14_spill]] %s4916_s2 }
   0x2   :  { %4926 = sst [smem:[#allocation15_spill]] %s4919_s5 }
   0x3   :  { %4927 = sst [smem:[#allocation16_spill]] %s4920_s6 }
   0x4   :  { %12 = vsyncpa [#allocation3], 0 }
   0x5   :  { %14 = vsyncpa [#allocation3 + $0x1], 0 }
   0x6   :  { %15 = vsyncpa [#allocation5], 0 }
   0x7   :  { %17 = vsyncpa [#allocation5 + $0x1], 0 }
   0x8   :  { %18 = vsyncpa [#allocation8], 0  ;;  %s4108_s24 = smov 0   ;;  %s4110_s25 = smov 0  }
   0x9   :  { %s4112_s26 = smov 0   ;;  %s4114_s27 = smov 0  }
   0xa LB: > { %s4127_s28 = sadd.s32 4294967295, %s4057_s27   ;;  %p86_p0 = scmp.ne.s32.totalorder %s4049_s25, %s4045_s24  ;;  %s4057_s27 = sphi %s4114_s27, %s4946_s27   ;;  %s4053_s26 = sphi %s4112_s26, %s4945_s26   ;;  %s4049_s25 = sphi %s4110_s25, %s4944_s25   ;;  %s4045_s24 = sphi %s4108_s24, %s4943_s24  }
   0xb   : > { %p4922_p1 = scmp.eq.s32.totalorder %s4127_s28, 0  ;;  %p3440_p2 = scmp.ge.s32.totalorder %s4057_s27, 1 }
   0xc   : > { %p217_p3 = scmp.lt.s32.totalorder %s4057_s27, 3  ;;  %s4059_s8 = smov [#allocation6]  }
   0xd   : > { %p4135_p4 = por %p4922_p1, %p86_p0  ;;  %s235_s9 = sshll.u32 %s4059_s8, 4  ;;  %s236_s9 = int_to_ptr.vmem [resolvable:$true] %s235_s9 }
   0xe   : > { %p4139_p5 = pnand %p3440_p2, %p217_p3  ;;  %s4060_s11 = smov [#allocation7]  }
   0xf   : > { %s4928_s29 = scalar_select %p4135_p4, 1, 0 }
  0x10   : > { %s4929_s30 = scalar_select %p4139_p5, 1, 0 }
  0x11   : > { %p3739_p6 = pneg %p4139_p5  ;;  %s249_s12 = sshll.u32 %s4060_s11, 4  ;;  %s250_s12 = int_to_ptr.vmem [resolvable:$true] %s249_s12 }
  0x12   : > { %s3914_s13 = scalar_lea.vmem %s236_s9, 16384  ;;  %p3922_p12 = scmp.lt.s32.totalorder %s236_s9, %s236_s9 }
  0x13   : > { %p4147_p7 = pnand %p3739_p6, %p4922_p1  ;;  %p3915_p9 = scmp.ne.s32.totalorder %s236_s9, %s3914_s13 }
  0x14   : > { %p3923_p13 = scmp.lt.s32.totalorder %s3914_s13, %s3914_s13 }
  0x15   : > { %p3905_p8 = pneg %p4147_p7 }
  0x16   : > { %p3924_p0 = por %p3923_p13, %p3922_p12 }
  0x17   : > { %p3917_p10 = pnand %p3915_p9, %p3905_p8 }
  0x19   : > { %p3918_p11 = pneg %p3917_p10 }
  0x1b   : > { %p3925_p2 = pnand %p3924_p0, %p3918_p11 }
  0x1d   : > { %3928 = shalt.err (!%p3925_p2)
}
  0x1e   : > { %s4061_s14 = smov 256   ;;  %s4062_s15 = smov 16  }
  0x1f   : > { %s4931_s5 = sld [smem:[#allocation15_spill]]  ;;  %s3940_s18 = scalar_lea.vmem %s250_s12, 32 }
  0x20   : > { %p3941_p3 = scmp.ne.s32.totalorder %s250_s12, %s3940_s18  ;;  %p3948_p10 = scmp.lt.s32.totalorder %s250_s12, %s250_s12 }
  0x21   : > { %p3949_p1 = scmp.lt.s32.totalorder %s3940_s18, %s3940_s18 }
  0x22   : > { %p3943_p6 = pnand %p3941_p3, %p3905_p8 }
  0x23   : > { %p3950_p12 = por %p3949_p1, %p3948_p10 }
  0x24   : > { %p3944_p9 = pneg %p3943_p6 }
  0x25   : > { %3742 = dma.hbm_to_vmem [thread:$0]  (!%p4147_p7), %s4931_s5, 16384, %s236_s9, [#allocation5], %s4061_s14, %s4061_s14, %s4062_s15  }
  0x26   : > { %p3951_p11 = pnand %p3950_p12, %p3944_p9 }
  0x28   : > { %3954 = shalt.err (!%p3951_p11)
}
  0x29   : > { %s4932_s6 = sld [smem:[#allocation16_spill]]  ;;  %s4170_s21 = sadd.s32 1, %s4057_s27  }
  0x2a   : > { %s73_s22 = sadd.s32 1, %s4053_s26  ;;  %s70_s23 = ssub.s32 %s4057_s27, %s4170_s21 }
  0x2b   : > { %p80_p1 = scmp.ne.s32.totalorder %s4053_s26, %s4049_s25  ;;  %p71_p8 = scmp.eq.s32.totalorder %s70_s23, 0 }
  0x2c   : > { %p81_p13 = scmp.eq.s32.totalorder %s4057_s27, 0  ;;  %p3755_p0 = scmp.lt.s32.totalorder %s4057_s27, 2 }
  0x2d   : > { %s4180_s24 = sand.u32 1, %s4053_s26   ;;  %s3724_s10 = sshll.u32 %s4057_s27, 15 }
  0x2e   : > { %s4183_s8 = scalar_select %p71_p8, %s4053_s26, %s73_s22  }
  0x2f   : > { %3745 = dma.hbm_to_vmem [thread:$0]  (!%p4147_p7), %s4932_s6, 32, %s250_s12, [#allocation8]  }
  0x30   : > { %4933 = sst [smem:[#allocation13_spill]] %s4183_s8  ;;  %p82_p2 = por %p81_p13, %p80_p1 }
  0x31   : > { %s3444_s9 = sshll.u32 %s4180_s24, 11  ;;  %s4934_s2 = sld [smem:[#allocation14_spill]] }
  0x32   : > { %s264_s14 = scalar_lea.vmem [#allocation2], %s3444_s9  ;;  %p4192_p7 = pnand %p3755_p0, %p82_p2 }
  0x33   : > { %s271_s15 = sshll.u32 %s264_s14, 4  ;;  %s261_s17 = scalar_lea.sflag [#allocation3], %s4180_s24  ;;  %s4196_s15 = int_to_ptr.vmem [resolvable:$true] %s271_s15 }
  0x34   : > { %p3957_p6 = pneg %p4192_p7 }
  0x37   : > { %s4190_s13 = scalar_lea.hbm %s4934_s2, %s3724_s10  ;;  %s3960_s22 = scalar_lea.hbm %s4934_s2, 65536 }
  0x38   : > { %s3955_s18 = scalar_lea.hbm %s4190_s13, 32768  ;;  %p3961_p12 = scmp.lt.s32.totalorder %s4190_s13, %s4934_s2 }
  0x39   : > { %p3956_p3 = scmp.ne.s32.totalorder %s4190_s13, %s3955_s18  ;;  %p3962_p11 = scmp.lt.s32.totalorder %s3960_s22, %s3955_s18 }
  0x3b   : > { %p3958_p9 = pnand %p3957_p6, %p3956_p3  ;;  %p3963_p1 = por %p3962_p11, %p3961_p12 }
  0x3d   : > { %p3959_p10 = pneg %p3958_p9 }
  0x3f   : > { %p3964_p8 = pnand %p3963_p1, %p3959_p10 }
  0x41   : > { %3967 = shalt.err (!%p3964_p8)
}
  0x42   : > { %s3968_s10 = scalar_lea.vmem %s4196_s15, 32768  ;;  %s4063_s11 = smov [#allocation2]  }
  0x43   : > { %p3969_p13 = scmp.ne.s32.totalorder %s4196_s15, %s3968_s10  ;;  %s3973_s12 = sshll.u32 %s4063_s11, 4  ;;  %s3974_s12 = int_to_ptr.vmem [resolvable:$false] %s3973_s12 }
  0x44   : > { %s3975_s14 = scalar_lea.vmem %s3974_s12, 65536  ;;  %p3976_p3 = scmp.lt.s32.totalorder %s4196_s15, %s3974_s12 }
  0x45   : > { %p3971_p0 = pnand %p3969_p13, %p3957_p6  ;;  %p3977_p9 = scmp.lt.s32.totalorder %s3975_s14, %s3968_s10 }
  0x47   : > { %p3972_p2 = pneg %p3971_p0  ;;  %p3978_p4 = por %p3977_p9, %p3976_p3 }
  0x49   : > { %p3979_p12 = pnand %p3978_p4, %p3972_p2 }
  0x4b   : > { %3982 = shalt.err (!%p3979_p12)
}
  0x4c   : > { %s4064_s18 = smov 512   ;;  %s4065_s19 = smov 32  }
  0x4d   : > { %3749 = dma.hbm_to_vmem [thread:$0]  (!%p4192_p7), %s4190_s13, 32768, %s4196_s15, %s261_s17, %s4064_s18, %s4064_s18, %s4065_s19  }
  0x4e   : > { %s288_s20 = sand.u32 1, %s4057_s27   ;;  %s3447_s22 = sshll.u32 %s4180_s24, 3 }
  0x4f   : > { %s3725_s23 = sshll.u32 %s4057_s27, 7  ;;  %s292_s9 = scalar_lea.vmem [#allocation4], %s3447_s22 }
  0x50   : > { %s300_s10 = sshll.u32 %s292_s9, 4  ;;  %s298_s14 = scalar_lea.hbm %s4918_s4, %s3725_s23  ;;  %s301_s10 = int_to_ptr.vmem [resolvable:$true] %s300_s10 }
  0x51   : > { %s289_s2 = scalar_lea.sflag [#allocation5], %s288_s20  ;;  %s3983_s5 = scalar_lea.hbm %s298_s14, 128 }
  0x52   : > { %p3984_p4 = scmp.ne.s32.totalorder %s298_s14, %s3983_s5  ;;  %s3988_s13 = scalar_lea.hbm %s4918_s4, 256 }
  0x53   : > { %p3989_p1 = scmp.lt.s32.totalorder %s298_s14, %s4918_s4  ;;  %p3990_p8 = scmp.lt.s32.totalorder %s3988_s13, %s3983_s5 }
  0x54   : > { %p3986_p10 = pnand %p3984_p4, %p3957_p6 }
  0x55   : > { %p3991_p13 = por %p3990_p8, %p3989_p1 }
  0x56   : > { %p3987_p11 = pneg %p3986_p10 }
  0x58   : > { %p3992_p0 = pnand %p3991_p13, %p3987_p11 }
  0x5a   : > { %3995 = shalt.err (!%p3992_p0)
}
  0x5b   : > { %s3996_s15 = scalar_lea.vmem %s301_s10, 128  ;;  %s4066_s17 = smov [#allocation4]  }
  0x5c   : > { %p3997_p2 = scmp.ne.s32.totalorder %s301_s10, %s3996_s15  ;;  %s4001_s18 = sshll.u32 %s4066_s17, 4  ;;  %s4002_s18 = int_to_ptr.vmem [resolvable:$false] %s4001_s18 }
  0x5d   : > { %s4003_s6 = scalar_lea.vmem %s4002_s18, 256  ;;  %p4004_p12 = scmp.lt.s32.totalorder %s301_s10, %s4002_s18 }
  0x5e   : > { %p3999_p3 = pnand %p3997_p2, %p3957_p6  ;;  %p4005_p4 = scmp.lt.s32.totalorder %s4003_s6, %s3996_s15 }
  0x60   : > { %p4000_p9 = pneg %p3999_p3  ;;  %p4006_p10 = por %p4005_p4, %p4004_p12 }
  0x62   : > { %p4007_p5 = pnand %p4006_p10, %p4000_p9 }
  0x64   : > { %4010 = shalt.err (!%p4007_p5)
}
  0x65   : > { %3752 = dma.hbm_to_vmem [thread:$0]  (!%p4192_p7), %s298_s14, 128, %s301_s10, %s289_s2  }
  0x66   : > { %p4936_p11 = scmp.ne.s32.totalorder %s4929_s30, 0 }
  0x67   : > { %s311_s5 = sand.u32 (!%p4936_p11), 1, %s4049_s25   ;;  %p4937_p6 = scmp.ne.s32.totalorder (!%p4936_p11), %s4928_s29, 0 }
  0x68   : > { %309 = sbr.rel (%p4936_p11) target bundleno = 1558 (0x616), region = 48  ;;  %s3451_s8 = sshll.u32 (!%p4936_p11), %s311_s5, 11 }
  0x69   : > { %s312_s19 = scalar_lea.sflag (!%p4936_p11), [#allocation3], %s311_s5  ;;  %s4248_s20 = scalar_lea.vmem (!%p4936_p11), [#allocation2], %s3451_s8 }
  0x6d   : > { %4028 = dma.done.wait (%p4937_p6), %s312_s19, 32768  }
  0x6e   : > { %4030 = vsyncadd (%p4937_p6), %s312_s19, 4294934528  ;;  %s320_s22 = sand.u32 1, %s4127_s28   ;;  %s3452_s16 = sshll.u32 %s311_s5, 3 }
  0x6f   : > { %s321_s2 = scalar_lea.sflag [#allocation5], %s320_s22  ;;  %s4255_s23 = scalar_lea.vmem [#allocation4], %s3452_s16 }
  0x70   : > { %4032 = dma.done.wait (%p4937_p6), %s321_s2, 128  }
  0x71   : > { %4034 = vsyncadd (%p4937_p6), %s321_s2, 4294967168  ;;  %p4938_p5 = scmp.eq.s32.totalorder %s4127_s28, 0 }
  0x73   : > { %4036 = dma.done.wait (%p4938_p5), [#allocation5], 16384   ;;  %p4939_p7 = pmov %p4938_p5 }
  0x74   : > { %p4940_p1 = pmov %p4938_p5 }
  0x75   : > { %4038 = vsyncadd (%p4939_p7), [#allocation5], 4294950912 }
  0x76   : > { %4040 = dma.done.wait (%p4940_p1), [#allocation8], 32   ;;  %p4941_p8 = pmov %p4940_p1 }
  0x77   : > { %v461_v0 = vld [vmem:[%s4248_s20 + $0x1c0] sm:$0xff]  ;;  %v4309_v59 = vld [vmem:[%s4915_s1 + $0xc] ss:$16 sps:$4 sm:$0xff]   ;;  %p372_p13 = scmp.lt.s32.totalorder %s4127_s28, 1  ;;  %vm2588_vm0 = vcmask 130112   ;;  %vm2599_vm1 = vcmask 1041409  }
  0x78   : > { %4042 = vsyncadd (%p4941_p8), [#allocation8], 4294967264  ;;  %v465_v1 = vld [vmem:[%s4248_s20 + $0x1e0] sm:$0xff]  ;;  %2108 = vmatprep.mubr.bf16.mxu1 %v4309_v59  ;;  %vm2602_vm2 = vcmask 123904   ;;  %vm3017_vm3 = vcmask 1043459   ;;  %vm3026_vm4 = vcmask 1041408  }
  0x79   : > { %v589_v2 = vld [vmem:[%s4248_s20 + $0x5c0] sm:$0xff]  ;;  %v3523_v3 = vcombine.high %v461_v0, %v465_v1  ;;  %v3522_v5 = vcombine.low %v461_v0, %v465_v1  ;;  %s4948_s28 = smov (!%p372_p13, %s4127_s28), 1 }
  0x7a   : > { %v593_v4 = vld [vmem:[%s4248_s20 + $0x5e0] sm:$0xff]  ;;  %s3455_s17 = sshll.u32 %s4948_s28, 3 }
  0x7b   : > { %v453_v6 = vld [vmem:[%s4248_s20 + $0x180] sm:$0xff]  ;;  %v3651_v8 = vcombine.high %v589_v2, %v593_v4  ;;  %v3650_v9 = vcombine.low %v589_v2, %v593_v4  ;;  %2023 = vmatprep.subr.bf16.mxu0 %v3523_v3  ;;  %s375_s5 = scalar_lea.vmem %s4917_s3, %s3455_s17  ;;  %s380_s14 = scalar_lea.vmem %s4921_s7, %s3455_s17 }
  0x7c   : > { %v457_v7 = vld [vmem:[%s4248_s20 + $0x1a0] sm:$0xff]  ;;  %2024 = vmatpush1.bf16.msra.mxu0 %v3522_v5 }
  0x7d   : > { %v3515_v10 = vcombine.high %v453_v6, %v457_v7  ;;  %v581_v11 = vld [vmem:[%s4248_s20 + $0x580] sm:$0xff]  ;;  %2076 = vmatprep.subr.bf16.mxu1 %v3651_v8  ;;  %v3514_v18 = vcombine.low %v453_v6, %v457_v7 }
  0x7e   : > { %v585_v12 = vld [vmem:[%s4248_s20 + $0x5a0] sm:$0xff]  ;;  %2077 = vmatpush1.bf16.msra.mxu1 %v3650_v9 }
  0x7f   : > { %v445_v13 = vld [vmem:[%s4248_s20 + $0x140] sm:$0xff]  ;;  %v3643_v14 = vcombine.high %v581_v11, %v585_v12  ;;  %2025 = vmatprep.subr.bf16.mxu0 %v3515_v10  ;;  %v3642_v19 = vcombine.low %v581_v11, %v585_v12 }
  0x80   : > { %v449_v15 = vld [vmem:[%s4248_s20 + $0x160] sm:$0xff]  ;;  %2026 = vmatpush1.bf16.msra.mxu0 %v3514_v18 }
  0x81   : > { %v573_v16 = vld [vmem:[%s4248_s20 + $0x540] sm:$0xff]  ;;  %v3507_v20 = vcombine.high %v445_v13, %v449_v15  ;;  %2078 = vmatprep.subr.bf16.mxu1 %v3643_v14  ;;  %v3506_v26 = vcombine.low %v445_v13, %v449_v15 }
  0x82   : > { %v577_v17 = vld [vmem:[%s4248_s20 + $0x560] sm:$0xff]  ;;  %2079 = vmatpush1.bf16.msra.mxu1 %v3642_v19 }
  0x83   : > { %v3635_v21 = vcombine.high %v573_v16, %v577_v17  ;;  %v437_v22 = vld [vmem:[%s4248_s20 + $0x100] sm:$0xff]  ;;  %2027 = vmatprep.subr.bf16.mxu0 %v3507_v20  ;;  %v3634_v27 = vcombine.low %v573_v16, %v577_v17 }
  0x84   : > { %v441_v23 = vld [vmem:[%s4248_s20 + $0x120] sm:$0xff]  ;;  %2028 = vmatpush1.bf16.msra.mxu0 %v3506_v26 }
  0x85   : > { %v565_v24 = vld [vmem:[%s4248_s20 + $0x500] sm:$0xff]  ;;  %v3499_v28 = vcombine.high %v437_v22, %v441_v23  ;;  %2080 = vmatprep.subr.bf16.mxu1 %v3635_v21  ;;  %v3498_v34 = vcombine.low %v437_v22, %v441_v23 }
  0x86   : > { %v569_v25 = vld [vmem:[%s4248_s20 + $0x520] sm:$0xff]  ;;  %2081 = vmatpush1.bf16.msra.mxu1 %v3634_v27 }
  0x87   : > { %v3627_v29 = vcombine.high %v565_v24, %v569_v25  ;;  %v429_v30 = vld [vmem:[%s4248_s20 + $0xc0] sm:$0xff]  ;;  %2029 = vmatprep.subr.bf16.mxu0 %v3499_v28  ;;  %v3626_v35 = vcombine.low %v565_v24, %v569_v25 }
  0x88   : > { %v433_v31 = vld [vmem:[%s4248_s20 + $0xe0] sm:$0xff]  ;;  %2030 = vmatpush1.bf16.msra.mxu0 %v3498_v34 }
  0x89   : > { %v557_v32 = vld [vmem:[%s4248_s20 + $0x4c0] sm:$0xff]  ;;  %v3491_v36 = vcombine.high %v429_v30, %v433_v31  ;;  %2082 = vmatprep.subr.bf16.mxu1 %v3627_v29  ;;  %v3490_v42 = vcombine.low %v429_v30, %v433_v31 }
  0x8a   : > { %v561_v33 = vld [vmem:[%s4248_s20 + $0x4e0] sm:$0xff]  ;;  %2083 = vmatpush1.bf16.msra.mxu1 %v3626_v35 }
  0x8b   : > { %v3619_v37 = vcombine.high %v557_v32, %v561_v33  ;;  %v421_v38 = vld [vmem:[%s4248_s20 + $0x80] sm:$0xff]  ;;  %2031 = vmatprep.subr.bf16.mxu0 %v3491_v36  ;;  %v3618_v43 = vcombine.low %v557_v32, %v561_v33 }
  0x8c   : > { %v425_v39 = vld [vmem:[%s4248_s20 + $0xa0] sm:$0xff]  ;;  %2032 = vmatpush1.bf16.msra.mxu0 %v3490_v42 }
  0x8d   : > { %v549_v40 = vld [vmem:[%s4248_s20 + $0x480] sm:$0xff]  ;;  %v3483_v44 = vcombine.high %v421_v38, %v425_v39  ;;  %2084 = vmatprep.subr.bf16.mxu1 %v3619_v37  ;;  %v3482_v50 = vcombine.low %v421_v38, %v425_v39 }
  0x8e   : > { %v553_v41 = vld [vmem:[%s4248_s20 + $0x4a0] sm:$0xff]  ;;  %2085 = vmatpush1.bf16.msra.mxu1 %v3618_v43 }
  0x8f   : > { %v3611_v45 = vcombine.high %v549_v40, %v553_v41  ;;  %v413_v46 = vld [vmem:[%s4248_s20 + $0x40] sm:$0xff]  ;;  %2033 = vmatprep.subr.bf16.mxu0 %v3483_v44  ;;  %v3610_v52 = vcombine.low %v549_v40, %v553_v41 }
  0x90   : > { %v417_v47 = vld [vmem:[%s4248_s20 + $0x60] sm:$0xff]  ;;  %2034 = vmatpush1.bf16.msra.mxu0 %v3482_v50 }
  0x91   : > { %v541_v48 = vld [vmem:[%s4248_s20 + $0x440] sm:$0xff]  ;;  %v3475_v53 = vcombine.high %v413_v46, %v417_v47  ;;  %2086 = vmatprep.subr.bf16.mxu1 %v3611_v45  ;;  %v3474_v60 = vcombine.low %v413_v46, %v417_v47 }
  0x92   : > { %v545_v49 = vld [vmem:[%s4248_s20 + $0x460] sm:$0xff]  ;;  %2087 = vmatpush1.bf16.msra.mxu1 %v3610_v52 }
  0x93   : > { %v405_v51 = vld [vmem:[%s4248_s20] sm:$0xff]  ;;  %v3603_v55 = vcombine.high %v541_v48, %v545_v49  ;;  %2035 = vmatprep.subr.bf16.mxu0 %v3475_v53  ;;  %v3602_v61 = vcombine.low %v541_v48, %v545_v49 }
  0x94   : > { %v409_v54 = vld [vmem:[%s4248_s20 + $0x20] sm:$0xff]  ;;  %2036 = vmatpush1.bf16.msra.mxu0 %v3474_v60 }
  0x95   : > { %v4302_v56 = vld [vmem:[%s4915_s1 + $0x4] ss:$16 sps:$4 sm:$0xff]   ;;  %v3467_v62 = vcombine.high %v405_v51, %v409_v54  ;;  %2088 = vmatprep.subr.bf16.mxu1 %v3603_v55  ;;  %v3466_v4 = vcombine.low %v405_v51, %v409_v54 }
  0x96   : > { %v533_v57 = vld [vmem:[%s4248_s20 + $0x400] sm:$0xff]  ;;  %2055 = vmatprep.mubr.bf16.mxu0 %v4302_v56  ;;  %2089 = vmatpush1.bf16.msra.mxu1 %v3602_v61 }
  0x97   : > { %v537_v58 = vld [vmem:[%s4248_s20 + $0x420] sm:$0xff]  ;;  %2037 = vmatprep.subr.bf16.mxu0 %v3467_v62 }
  0x98   : > { %v3595_v63 = vcombine.high %v533_v57, %v537_v58  ;;  %v525_v0 = vld [vmem:[%s4248_s20 + $0x3c0] sm:$0xff]  ;;  %v3594_v5 = vcombine.low %v533_v57, %v537_v58  ;;  %2038 = vmatpush1.bf16.msra.mxu0 %v3466_v4  ;;  %v590_v4 = vld [vmem:[%s4248_s20 + $0x5c8] sm:$0xff] }
  0x99   : > { %v529_v1 = vld [vmem:[%s4248_s20 + $0x3e0] sm:$0xff] }
  0x9a   : > { %v653_v2 = vld [vmem:[%s4248_s20 + $0x7c0] sm:$0xff]  ;;  %v3587_v6 = vcombine.high %v525_v0, %v529_v1  ;;  %2090 = vmatprep.subr.bf16.mxu1 %v3595_v63  ;;  %v3586_v12 = vcombine.low %v525_v0, %v529_v1 }
  0x9b   : > { %v657_v3 = vld [vmem:[%s4248_s20 + $0x7e0] sm:$0xff]  ;;  %2091 = vmatpush1.bf16.msra.mxu1 %v3594_v5  ;;  %v594_v5 = vld [vmem:[%s4248_s20 + $0x5e8] sm:$0xff] }
  0x9c   : > { %v3715_v7 = vcombine.high %v653_v2, %v657_v3  ;;  %v517_v8 = vld [vmem:[%s4248_s20 + $0x380] sm:$0xff]  ;;  %2039 = vmatprep.subr.bf16.mxu0 %v3587_v6  ;;  %v3714_v13 = vcombine.low %v653_v2, %v657_v3  ;;  %v462_v2 = vld [vmem:[%s4248_s20 + $0x1c8] sm:$0xff] }
  0x9d   : > { %v521_v9 = vld [vmem:[%s4248_s20 + $0x3a0] sm:$0xff]  ;;  %2040 = vmatpush2.bf16.msra.mxu0 %v3586_v12  ;;  %v466_v3 = vld [vmem:[%s4248_s20 + $0x1e8] sm:$0xff] }
  0x9e   : > { %v645_v10 = vld [vmem:[%s4248_s20 + $0x780] sm:$0xff]  ;;  %v3579_v14 = vcombine.high %v517_v8, %v521_v9  ;;  %2092 = vmatprep.subr.bf16.mxu1 %v3715_v7  ;;  %v3578_v20 = vcombine.low %v517_v8, %v521_v9  ;;  %v3525_v8 = vcombine.high %v462_v2, %v466_v3  ;;  %v3653_v9 = vcombine.high %v590_v4, %v594_v5 }
  0x9f   : > { %v649_v11 = vld [vmem:[%s4248_s20 + $0x7a0] sm:$0xff]  ;;  %2093 = vmatpush2.bf16.msra.mxu1 %v3714_v13  ;;  %v582_v13 = vld [vmem:[%s4248_s20 + $0x588] sm:$0xff] }
  0xa0   : > { %v3707_v15 = vcombine.high %v645_v10, %v649_v11  ;;  %v509_v16 = vld [vmem:[%s4248_s20 + $0x340] sm:$0xff]  ;;  %2041 = vmatprep.subr.bf16.mxu0 %v3579_v14  ;;  %v3706_v21 = vcombine.low %v645_v10, %v649_v11  ;;  %v454_v10 = vld [vmem:[%s4248_s20 + $0x188] sm:$0xff] }
  0xa1   : > { %v513_v17 = vld [vmem:[%s4248_s20 + $0x360] sm:$0xff]  ;;  %2042 = vmatpush2.bf16.msra.mxu0 %v3578_v20  ;;  %v458_v11 = vld [vmem:[%s4248_s20 + $0x1a8] sm:$0xff] }
  0xa2   : > { %v637_v18 = vld [vmem:[%s4248_s20 + $0x740] sm:$0xff]  ;;  %v3571_v22 = vcombine.high %v509_v16, %v513_v17  ;;  %2094 = vmatprep.subr.bf16.mxu1 %v3707_v15  ;;  %v3570_v28 = vcombine.low %v509_v16, %v513_v17  ;;  %v586_v14 = vld [vmem:[%s4248_s20 + $0x5a8] sm:$0xff]  ;;  %v3524_v16 = vcombine.low %v462_v2, %v466_v3  ;;  %v3652_v17 = vcombine.low %v590_v4, %v594_v5 }
  0xa3   : > { %v641_v19 = vld [vmem:[%s4248_s20 + $0x760] sm:$0xff]  ;;  %2095 = vmatpush2.bf16.msra.mxu1 %v3706_v21  ;;  %v4361_v15 = vld [vmem:[%s4915_s1 + $0x8] ss:$16 sps:$4 sm:$0xff]  }
  0xa4   : > { %v3699_v23 = vcombine.high %v637_v18, %v641_v19  ;;  %v501_v24 = vld [vmem:[%s4248_s20 + $0x300] sm:$0xff]  ;;  %2043 = vmatprep.subr.bf16.mxu0 %v3571_v22  ;;  %v3698_v29 = vcombine.low %v637_v18, %v641_v19  ;;  %v3517_v18 = vcombine.high %v454_v10, %v458_v11  ;;  %v3645_v19 = vcombine.high %v582_v13, %v586_v14  ;;  %v446_v20 = vld [vmem:[%s4248_s20 + $0x148] sm:$0xff] }
  0xa5   : > { %v505_v25 = vld [vmem:[%s4248_s20 + $0x320] sm:$0xff]  ;;  %2044 = vmatpush2.bf16.msra.mxu0 %v3570_v28  ;;  %v450_v21 = vld [vmem:[%s4248_s20 + $0x168] sm:$0xff] }
  0xa6   : > { %v629_v26 = vld [vmem:[%s4248_s20 + $0x700] sm:$0xff]  ;;  %v3563_v30 = vcombine.high %v501_v24, %v505_v25  ;;  %2096 = vmatprep.subr.bf16.mxu1 %v3699_v23  ;;  %v3562_v36 = vcombine.low %v501_v24, %v505_v25  ;;  %v574_v23 = vld [vmem:[%s4248_s20 + $0x548] sm:$0xff]  ;;  %v3509_v28 = vcombine.high %v446_v20, %v450_v21 }
  0xa7   : > { %v633_v27 = vld [vmem:[%s4248_s20 + $0x720] sm:$0xff]  ;;  %2097 = vmatpush2.bf16.msra.mxu1 %v3698_v29  ;;  %v578_v24 = vld [vmem:[%s4248_s20 + $0x568] sm:$0xff] }
  0xa8   : > { %v3691_v31 = vcombine.high %v629_v26, %v633_v27  ;;  %v493_v32 = vld [vmem:[%s4248_s20 + $0x2c0] sm:$0xff]  ;;  %2045 = vmatprep.subr.bf16.mxu0 %v3563_v30  ;;  %v3690_v37 = vcombine.low %v629_v26, %v633_v27  ;;  %v4376_v25 = vld [vmem:[%s4915_s1 + $0x2c] ss:$16 sps:$4 sm:$0xff]   ;;  %v3516_v26 = vcombine.low %v454_v10, %v458_v11  ;;  %v3644_v27 = vcombine.low %v582_v13, %v586_v14 }
  0xa9   : > { %v497_v33 = vld [vmem:[%s4248_s20 + $0x2e0] sm:$0xff]  ;;  %2046 = vmatpush2.bf16.msra.mxu0 %v3562_v36  ;;  %v3637_v29 = vcombine.high %v574_v23, %v578_v24  ;;  %v438_v30 = vld [vmem:[%s4248_s20 + $0x108] sm:$0xff] }
  0xaa   : > { %v621_v34 = vld [vmem:[%s4248_s20 + $0x6c0] sm:$0xff]  ;;  %v3555_v38 = vcombine.high %v493_v32, %v497_v33  ;;  %2098 = vmatprep.subr.bf16.mxu1 %v3691_v31  ;;  %v3554_v44 = vcombine.low %v493_v32, %v497_v33  ;;  %v442_v31 = vld [vmem:[%s4248_s20 + $0x128] sm:$0xff] }
  0xab   : > { %v625_v35 = vld [vmem:[%s4248_s20 + $0x6e0] sm:$0xff]  ;;  %2099 = vmatpush2.bf16.msra.mxu1 %v3690_v37  ;;  %v566_v32 = vld [vmem:[%s4248_s20 + $0x508] sm:$0xff]  ;;  %v3636_v37 = vcombine.low %v574_v23, %v578_v24 }
  0xac   : > { %v3683_v39 = vcombine.high %v621_v34, %v625_v35  ;;  %v485_v40 = vld [vmem:[%s4248_s20 + $0x280] sm:$0xff]  ;;  %2047 = vmatprep.subr.bf16.mxu0 %v3555_v38  ;;  %v3682_v45 = vcombine.low %v621_v34, %v625_v35  ;;  %v570_v33 = vld [vmem:[%s4248_s20 + $0x528] sm:$0xff]  ;;  %v3508_v35 = vcombine.low %v446_v20, %v450_v21  ;;  %v3501_v38 = vcombine.high %v438_v30, %v442_v31 }
  0xad   : > { %v489_v41 = vld [vmem:[%s4248_s20 + $0x2a0] sm:$0xff]  ;;  %2048 = vmatpush2.bf16.msra.mxu0 %v3554_v44  ;;  %v4393_v36 = vld [vmem:[%s4915_s1 + $0x28] ss:$16 sps:$4 sm:$0xff]   ;;  %v3500_v44 = vcombine.low %v438_v30, %v442_v31 }
  0xae   : > { %v613_v42 = vld [vmem:[%s4248_s20 + $0x680] sm:$0xff]  ;;  %v3547_v46 = vcombine.high %v485_v40, %v489_v41  ;;  %2100 = vmatprep.subr.bf16.mxu1 %v3683_v39  ;;  %v3546_v52 = vcombine.low %v485_v40, %v489_v41  ;;  %v3629_v39 = vcombine.high %v566_v32, %v570_v33  ;;  %v430_v40 = vld [vmem:[%s4248_s20 + $0xc8] sm:$0xff] }
  0xaf   : > { %v617_v43 = vld [vmem:[%s4248_s20 + $0x6a0] sm:$0xff]  ;;  %2101 = vmatpush2.bf16.msra.mxu1 %v3682_v45  ;;  %v434_v41 = vld [vmem:[%s4248_s20 + $0xe8] sm:$0xff]  ;;  %v3628_v45 = vcombine.low %v566_v32, %v570_v33 }
  0xb0   : > { %v3675_v47 = vcombine.high %v613_v42, %v617_v43  ;;  %v477_v48 = vld [vmem:[%s4248_s20 + $0x240] sm:$0xff]  ;;  %2049 = vmatprep.subr.bf16.mxu0 %v3547_v46  ;;  %v3674_v53 = vcombine.low %v613_v42, %v617_v43  ;;  %v558_v42 = vld [vmem:[%s4248_s20 + $0x4c8] sm:$0xff]  ;;  %v3493_v46 = vcombine.high %v430_v40, %v434_v41 }
  0xb1   : > { %v481_v49 = vld [vmem:[%s4248_s20 + $0x260] sm:$0xff]  ;;  %2050 = vmatpush2.bf16.msra.mxu0 %v3546_v52  ;;  %v562_v43 = vld [vmem:[%s4248_s20 + $0x4e8] sm:$0xff]  ;;  %v3492_v52 = vcombine.low %v430_v40, %v434_v41 }
  0xb2   : > { %v605_v50 = vld [vmem:[%s4248_s20 + $0x640] sm:$0xff]  ;;  %v3539_v54 = vcombine.high %v477_v48, %v481_v49  ;;  %2102 = vmatprep.subr.bf16.mxu1 %v3675_v47  ;;  %v3538_v62 = vcombine.low %v477_v48, %v481_v49  ;;  %v3621_v47 = vcombine.high %v558_v42, %v562_v43  ;;  %v422_v48 = vld [vmem:[%s4248_s20 + $0x88] sm:$0xff] }
  0xb3   : > { %v609_v51 = vld [vmem:[%s4248_s20 + $0x660] sm:$0xff]  ;;  %2103 = vmatpush2.bf16.msra.mxu1 %v3674_v53  ;;  %v426_v49 = vld [vmem:[%s4248_s20 + $0xa8] sm:$0xff]  ;;  %v3620_v53 = vcombine.low %v558_v42, %v562_v43 }
  0xb4   : > { %v3667_v55 = vcombine.high %v605_v50, %v609_v51  ;;  %v469_v57 = vld [vmem:[%s4248_s20 + $0x200] sm:$0xff]  ;;  %2051 = vmatprep.subr.bf16.mxu0 %v3539_v54  ;;  %v3666_v63 = vcombine.low %v605_v50, %v609_v51  ;;  %v550_v50 = vld [vmem:[%s4248_s20 + $0x488] sm:$0xff]  ;;  %v3485_v54 = vcombine.high %v422_v48, %v426_v49 }
  0xb5   : > { %v473_v58 = vld [vmem:[%s4248_s20 + $0x220] sm:$0xff]  ;;  %2052 = vmatpush2.bf16.msra.mxu0 %v3538_v62  ;;  %v554_v51 = vld [vmem:[%s4248_s20 + $0x4a8] sm:$0xff]  ;;  %v3484_v62 = vcombine.low %v422_v48, %v426_v49 }
  0xb6   : > { %v597_v60 = vld [vmem:[%s4248_s20 + $0x600] sm:$0xff]  ;;  %v3531_v0 = vcombine.high %v469_v57, %v473_v58  ;;  %2104 = vmatprep.subr.bf16.mxu1 %v3667_v55  ;;  %v3530_v6 = vcombine.low %v469_v57, %v473_v58  ;;  %v3613_v55 = vcombine.high %v550_v50, %v554_v51  ;;  %v414_v57 = vld [vmem:[%s4248_s20 + $0x48] sm:$0xff] }
  0xb7   : > { %v601_v61 = vld [vmem:[%s4248_s20 + $0x620] sm:$0xff]  ;;  %2105 = vmatpush2.bf16.msra.mxu1 %v3666_v63  ;;  %v418_v58 = vld [vmem:[%s4248_s20 + $0x68] sm:$0xff]  ;;  %v3612_v63 = vcombine.low %v550_v50, %v554_v51 }
  0xb8   : > { %v3659_v1 = vcombine.high %v597_v60, %v601_v61  ;;  %2053 = vmatprep.subr.bf16.mxu0 %v3531_v0  ;;  %v3658_v7 = vcombine.low %v597_v60, %v601_v61  ;;  %v4354_v12 = vld [vmem:[%s4915_s1] ss:$16 sps:$4 sm:$0xff]   ;;  %v4368_v22 = vld [vmem:[%s4915_s1 + $0x24] ss:$16 sps:$4 sm:$0xff]   ;;  %v542_v60 = vld [vmem:[%s4248_s20 + $0x448] sm:$0xff]  ;;  %v3477_v0 = vcombine.high %v414_v57, %v418_v58 }
  0xb9   : > { %2054 = vmatpush2.bf16.msra.mxu0 %v3530_v6  ;;  %v4387_v34 = vld [vmem:[%s4915_s1 + $0x20] ss:$16 sps:$4 sm:$0xff]   ;;  %v546_v61 = vld [vmem:[%s4248_s20 + $0x468] sm:$0xff]  ;;  %v3476_v6 = vcombine.low %v414_v57, %v418_v58 }
  0xba   : > { %2106 = vmatprep.subr.bf16.mxu1 %v3659_v1  ;;  %2129 = vmatprep.subr.bf16.mxu0 %v3525_v8  ;;  %v3605_v1 = vcombine.high %v542_v60, %v546_v61  ;;  %v406_v2 = vld [vmem:[%s4248_s20 + $0x8] sm:$0xff] }
  0xbb   : > { %2107 = vmatpush2.bf16.msra.mxu1 %v3658_v7  ;;  %v410_v3 = vld [vmem:[%s4248_s20 + $0x28] sm:$0xff]  ;;  %v3604_v7 = vcombine.low %v542_v60, %v546_v61 }
  0xbc   : > { %2182 = vmatprep.subr.bf16.mxu1 %v3653_v9  ;;  %2056 = vmatmul.mubr.bf16.vlgmr.msra.gmra.mxu0 %v4354_v12  ;;  %v534_v4 = vld [vmem:[%s4248_s20 + $0x408] sm:$0xff]  ;;  %v3469_v8 = vcombine.high %v406_v2, %v410_v3 }
  0xbd   : > { %2130 = vmatpush1.bf16.msra.mxu0 %v3524_v16  ;;  %2065 = vmatprep.mubr.bf16.mxu0 %v4368_v22  ;;  %v538_v5 = vld [vmem:[%s4248_s20 + $0x428] sm:$0xff]  ;;  %v3468_v16 = vcombine.low %v406_v2, %v410_v3 }
  0xbe   : > { %2109 = vmatmul.mubr.bf16.vlgmr.msra.gmra.mxu1 %v4361_v15  ;;  %2131 = vmatprep.subr.bf16.mxu0 %v3517_v18  ;;  %v3597_v9 = vcombine.high %v534_v4, %v538_v5  ;;  %v526_v10 = vld [vmem:[%s4248_s20 + $0x3c8] sm:$0xff] }
  0xbf   : > { %2183 = vmatpush1.bf16.msra.mxu1 %v3652_v17  ;;  %2118 = vmatprep.mubr.bf16.mxu1 %v4376_v25  ;;  %v530_v11 = vld [vmem:[%s4248_s20 + $0x3e8] sm:$0xff]  ;;  %v3596_v17 = vcombine.low %v534_v4, %v538_v5 }
  0xc0   : > { %2184 = vmatprep.subr.bf16.mxu1 %v3645_v19  ;;  %v654_v13 = vld [vmem:[%s4248_s20 + $0x7c8] sm:$0xff]  ;;  %v3589_v18 = vcombine.high %v526_v10, %v530_v11 }
  0xc1   : > { %2132 = vmatpush1.bf16.msra.mxu0 %v3516_v26  ;;  %v658_v14 = vld [vmem:[%s4248_s20 + $0x7e8] sm:$0xff]  ;;  %v3588_v26 = vcombine.low %v526_v10, %v530_v11 }
  0xc2   : > { %2133 = vmatprep.subr.bf16.mxu0 %v3509_v28  ;;  %v3717_v19 = vcombine.high %v654_v13, %v658_v14  ;;  %v518_v20 = vld [vmem:[%s4248_s20 + $0x388] sm:$0xff] }
  0xc3   : > { %2185 = vmatpush1.bf16.msra.mxu1 %v3644_v27  ;;  %v522_v21 = vld [vmem:[%s4248_s20 + $0x3a8] sm:$0xff]  ;;  %v3716_v27 = vcombine.low %v654_v13, %v658_v14 }
  0xc4   : > { %2186 = vmatprep.subr.bf16.mxu1 %v3637_v29  ;;  %2066 = vmatmul.mubr.bf16.gmra.mxu0 %v4387_v34  ;;  %v646_v23 = vld [vmem:[%s4248_s20 + $0x788] sm:$0xff]  ;;  %v3581_v28 = vcombine.high %v518_v20, %v522_v21 }
  0xc5   : > { %2134 = vmatpush1.bf16.msra.mxu0 %v3508_v35  ;;  %2161 = vmatprep.mubr.bf16.mxu0 %v4302_v56  ;;  %v650_v24 = vld [vmem:[%s4248_s20 + $0x7a8] sm:$0xff]  ;;  %v3580_v35 = vcombine.low %v518_v20, %v522_v21  ;;  %v463_v20 = vld [vmem:[%s4248_s20 + $0x1d0] sm:$0xff] }
  0xc6   : > { %2119 = vmatmul.mubr.bf16.gmra.mxu1 %v4393_v36  ;;  %2135 = vmatprep.subr.bf16.mxu0 %v3501_v38  ;;  %v3709_v29 = vcombine.high %v646_v23, %v650_v24  ;;  %v510_v30 = vld [vmem:[%s4248_s20 + $0x348] sm:$0xff]  ;;  %v467_v21 = vld [vmem:[%s4248_s20 + $0x1f0] sm:$0xff] }
  0xc7   : > { %2187 = vmatpush1.bf16.msra.mxu1 %v3636_v37  ;;  %2214 = vmatprep.mubr.bf16.mxu1 %v4309_v59  ;;  %v514_v31 = vld [vmem:[%s4248_s20 + $0x368] sm:$0xff]  ;;  %v3708_v37 = vcombine.low %v646_v23, %v650_v24  ;;  %v591_v23 = vld [vmem:[%s4248_s20 + $0x5d0] sm:$0xff] }
  0xc8   : > { %2188 = vmatprep.subr.bf16.mxu1 %v3629_v39  ;;  %v638_v32 = vld [vmem:[%s4248_s20 + $0x748] sm:$0xff]  ;;  %v3573_v38 = vcombine.high %v510_v30, %v514_v31  ;;  %v595_v24 = vld [vmem:[%s4248_s20 + $0x5f0] sm:$0xff] }
  0xc9   : > { %2136 = vmatpush1.bf16.msra.mxu0 %v3500_v44  ;;  %v642_v33 = vld [vmem:[%s4248_s20 + $0x768] sm:$0xff]  ;;  %v3572_v44 = vcombine.low %v510_v30, %v514_v31  ;;  %v455_v30 = vld [vmem:[%s4248_s20 + $0x190] sm:$0xff] }
  0xca   : > { %2137 = vmatprep.subr.bf16.mxu0 %v3493_v46  ;;  %v3701_v39 = vcombine.high %v638_v32, %v642_v33  ;;  %v502_v40 = vld [vmem:[%s4248_s20 + $0x308] sm:$0xff]  ;;  %v459_v31 = vld [vmem:[%s4248_s20 + $0x1b0] sm:$0xff] }
  0xcb   : > { %2189 = vmatpush1.bf16.msra.mxu1 %v3628_v45  ;;  %v506_v41 = vld [vmem:[%s4248_s20 + $0x328] sm:$0xff]  ;;  %v3700_v45 = vcombine.low %v638_v32, %v642_v33  ;;  %v583_v32 = vld [vmem:[%s4248_s20 + $0x590] sm:$0xff] }
  0xcc   : > { %2190 = vmatprep.subr.bf16.mxu1 %v3621_v47  ;;  %v630_v42 = vld [vmem:[%s4248_s20 + $0x708] sm:$0xff]  ;;  %v3565_v46 = vcombine.high %v502_v40, %v506_v41  ;;  %v587_v33 = vld [vmem:[%s4248_s20 + $0x5b0] sm:$0xff] }
  0xcd   : > { %2138 = vmatpush1.bf16.msra.mxu0 %v3492_v52  ;;  %v634_v43 = vld [vmem:[%s4248_s20 + $0x728] sm:$0xff]  ;;  %v3564_v52 = vcombine.low %v502_v40, %v506_v41  ;;  %v447_v40 = vld [vmem:[%s4248_s20 + $0x150] sm:$0xff] }
  0xce   : > { %2139 = vmatprep.subr.bf16.mxu0 %v3485_v54  ;;  %v3693_v47 = vcombine.high %v630_v42, %v634_v43  ;;  %v494_v48 = vld [vmem:[%s4248_s20 + $0x2c8] sm:$0xff]  ;;  %v451_v41 = vld [vmem:[%s4248_s20 + $0x170] sm:$0xff] }
  0xcf   : > { %2191 = vmatpush1.bf16.msra.mxu1 %v3620_v53  ;;  %v498_v49 = vld [vmem:[%s4248_s20 + $0x2e8] sm:$0xff]  ;;  %v3692_v53 = vcombine.low %v630_v42, %v634_v43  ;;  %v575_v42 = vld [vmem:[%s4248_s20 + $0x550] sm:$0xff] }
  0xd0   : > { %2192 = vmatprep.subr.bf16.mxu1 %v3613_v55  ;;  %v622_v50 = vld [vmem:[%s4248_s20 + $0x6c8] sm:$0xff]  ;;  %v3557_v54 = vcombine.high %v494_v48, %v498_v49  ;;  %v579_v43 = vld [vmem:[%s4248_s20 + $0x570] sm:$0xff] }
  0xd1   : > { %2140 = vmatpush1.bf16.msra.mxu0 %v3484_v62  ;;  %v626_v51 = vld [vmem:[%s4248_s20 + $0x6e8] sm:$0xff]  ;;  %v3556_v62 = vcombine.low %v494_v48, %v498_v49  ;;  %v439_v48 = vld [vmem:[%s4248_s20 + $0x110] sm:$0xff] }
  0xd2   : > { %2141 = vmatprep.subr.bf16.mxu0 %v3477_v0  ;;  %v3685_v55 = vcombine.high %v622_v50, %v626_v51  ;;  %v486_v57 = vld [vmem:[%s4248_s20 + $0x288] sm:$0xff]  ;;  %v443_v49 = vld [vmem:[%s4248_s20 + $0x130] sm:$0xff] }
  0xd3   : > { %2193 = vmatpush1.bf16.msra.mxu1 %v3612_v63  ;;  %v490_v58 = vld [vmem:[%s4248_s20 + $0x2a8] sm:$0xff]  ;;  %v3684_v63 = vcombine.low %v622_v50, %v626_v51  ;;  %v567_v50 = vld [vmem:[%s4248_s20 + $0x510] sm:$0xff] }
  0xd4   : > { %2194 = vmatprep.subr.bf16.mxu1 %v3605_v1  ;;  %v614_v60 = vld [vmem:[%s4248_s20 + $0x688] sm:$0xff]  ;;  %v3549_v0 = vcombine.high %v486_v57, %v490_v58  ;;  %v571_v51 = vld [vmem:[%s4248_s20 + $0x530] sm:$0xff] }
  0xd5   : > { %2142 = vmatpush1.bf16.msra.mxu0 %v3476_v6  ;;  %v618_v61 = vld [vmem:[%s4248_s20 + $0x6a8] sm:$0xff]  ;;  %v3548_v6 = vcombine.low %v486_v57, %v490_v58  ;;  %v431_v57 = vld [vmem:[%s4248_s20 + $0xd0] sm:$0xff] }
  0xd6   : > { %2143 = vmatprep.subr.bf16.mxu0 %v3469_v8  ;;  %v3677_v1 = vcombine.high %v614_v60, %v618_v61  ;;  %v478_v2 = vld [vmem:[%s4248_s20 + $0x248] sm:$0xff]  ;;  %v435_v58 = vld [vmem:[%s4248_s20 + $0xf0] sm:$0xff] }
  0xd7   : > { %2195 = vmatpush1.bf16.msra.mxu1 %v3604_v7  ;;  %v482_v3 = vld [vmem:[%s4248_s20 + $0x268] sm:$0xff]  ;;  %v3676_v7 = vcombine.low %v614_v60, %v618_v61  ;;  %v559_v60 = vld [vmem:[%s4248_s20 + $0x4d0] sm:$0xff] }
  0xd8   : > { %2196 = vmatprep.subr.bf16.mxu1 %v3597_v9  ;;  %v606_v4 = vld [vmem:[%s4248_s20 + $0x648] sm:$0xff]  ;;  %v3541_v8 = vcombine.high %v478_v2, %v482_v3  ;;  %v563_v61 = vld [vmem:[%s4248_s20 + $0x4f0] sm:$0xff] }
  0xd9   : > { %2144 = vmatpush1.bf16.msra.mxu0 %v3468_v16  ;;  %v610_v5 = vld [vmem:[%s4248_s20 + $0x668] sm:$0xff]  ;;  %v3540_v16 = vcombine.low %v478_v2, %v482_v3  ;;  %v423_v2 = vld [vmem:[%s4248_s20 + $0x90] sm:$0xff] }
  0xda   : > { %2145 = vmatprep.subr.bf16.mxu0 %v3589_v18  ;;  %v3669_v9 = vcombine.high %v606_v4, %v610_v5  ;;  %v470_v10 = vld [vmem:[%s4248_s20 + $0x208] sm:$0xff]  ;;  %v427_v3 = vld [vmem:[%s4248_s20 + $0xb0] sm:$0xff] }
  0xdb   : > { %2197 = vmatpush1.bf16.msra.mxu1 %v3596_v17  ;;  %v474_v11 = vld [vmem:[%s4248_s20 + $0x228] sm:$0xff]  ;;  %v3668_v17 = vcombine.low %v606_v4, %v610_v5  ;;  %v551_v4 = vld [vmem:[%s4248_s20 + $0x490] sm:$0xff] }
  0xdc   : > { %2198 = vmatprep.subr.bf16.mxu1 %v3717_v19  ;;  %v598_v13 = vld [vmem:[%s4248_s20 + $0x608] sm:$0xff]  ;;  %v3533_v18 = vcombine.high %v470_v10, %v474_v11  ;;  %v555_v5 = vld [vmem:[%s4248_s20 + $0x4b0] sm:$0xff] }
  0xdd   : > { %2146 = vmatpush2.bf16.msra.mxu0 %v3588_v26  ;;  %v602_v14 = vld [vmem:[%s4248_s20 + $0x628] sm:$0xff]  ;;  %v3532_v26 = vcombine.low %v470_v10, %v474_v11  ;;  %v415_v10 = vld [vmem:[%s4248_s20 + $0x50] sm:$0xff] }
  0xde   : > { %2147 = vmatprep.subr.bf16.mxu0 %v3581_v28  ;;  %v3661_v19 = vcombine.high %v598_v13, %v602_v14  ;;  %v3527_v28 = vcombine.high %v463_v20, %v467_v21  ;;  %v419_v11 = vld [vmem:[%s4248_s20 + $0x70] sm:$0xff] }
  0xdf   : > { %2199 = vmatpush2.bf16.msra.mxu1 %v3716_v27  ;;  %v3660_v27 = vcombine.low %v598_v13, %v602_v14  ;;  %v543_v13 = vld [vmem:[%s4248_s20 + $0x450] sm:$0xff]  ;;  %v3486_v14 = vcombine.low %v423_v2, %v427_v3 }
  0xe0   : > { %2200 = vmatprep.subr.bf16.mxu1 %v3709_v29  ;;  %v3655_v29 = vcombine.high %v591_v23, %v595_v24 }
  0xe1   : > { %2148 = vmatpush2.bf16.msra.mxu0 %v3580_v35  ;;  %v3526_v35 = vcombine.low %v463_v20, %v467_v21  ;;  %v535_v20 = vld [vmem:[%s4248_s20 + $0x410] sm:$0xff] }
  0xe2   : > { %2149 = vmatprep.subr.bf16.mxu0 %v3573_v38  ;;  %v3519_v38 = vcombine.high %v455_v30, %v459_v31  ;;  %v539_v21 = vld [vmem:[%s4248_s20 + $0x430] sm:$0xff] }
  0xe3   : > { %2201 = vmatpush2.bf16.msra.mxu1 %v3708_v37  ;;  %v3654_v37 = vcombine.low %v591_v23, %v595_v24  ;;  %v3478_v23 = vcombine.low %v415_v10, %v419_v11 }
  0xe4   : > { %2202 = vmatprep.subr.bf16.mxu1 %v3701_v39  ;;  %v3647_v39 = vcombine.high %v583_v32, %v587_v33 }
  0xe5   : > { %2150 = vmatpush2.bf16.msra.mxu0 %v3572_v44  ;;  %v3518_v44 = vcombine.low %v455_v30, %v459_v31  ;;  %v655_v30 = vld [vmem:[%s4248_s20 + $0x7d0] sm:$0xff] }
  0xe6   : > { %2151 = vmatprep.subr.bf16.mxu0 %v3565_v46  ;;  %v3511_v46 = vcombine.high %v447_v40, %v451_v41  ;;  %v659_v31 = vld [vmem:[%s4248_s20 + $0x7f0] sm:$0xff] }
  0xe7   : > { %2203 = vmatpush2.bf16.msra.mxu1 %v3700_v45  ;;  %v3646_v45 = vcombine.low %v583_v32, %v587_v33  ;;  %v3598_v33 = vcombine.low %v535_v20, %v539_v21 }
  0xe8   : > { %2204 = vmatprep.subr.bf16.mxu1 %v3693_v47  ;;  %v3639_v47 = vcombine.high %v575_v42, %v579_v43 }
  0xe9   : > { %2152 = vmatpush2.bf16.msra.mxu0 %v3564_v52  ;;  %v3510_v52 = vcombine.low %v447_v40, %v451_v41  ;;  %v647_v40 = vld [vmem:[%s4248_s20 + $0x790] sm:$0xff] }
  0xea   : > { %2153 = vmatprep.subr.bf16.mxu0 %v3557_v54  ;;  %v3503_v54 = vcombine.high %v439_v48, %v443_v49  ;;  %v651_v41 = vld [vmem:[%s4248_s20 + $0x7b0] sm:$0xff] }
  0xeb   : > { %2205 = vmatpush2.bf16.msra.mxu1 %v3692_v53  ;;  %v3638_v53 = vcombine.low %v575_v42, %v579_v43  ;;  %v3718_v43 = vcombine.low %v655_v30, %v659_v31 }
  0xec   : > { %2206 = vmatprep.subr.bf16.mxu1 %v3685_v55  ;;  %v3631_v55 = vcombine.high %v567_v50, %v571_v51 }
  0xed   : > { %2154 = vmatpush2.bf16.msra.mxu0 %v3556_v62  ;;  %v3502_v62 = vcombine.low %v439_v48, %v443_v49  ;;  %v639_v48 = vld [vmem:[%s4248_s20 + $0x750] sm:$0xff] }
  0xee   : > { %2155 = vmatprep.subr.bf16.mxu0 %v3549_v0  ;;  %v3495_v0 = vcombine.high %v431_v57, %v435_v58  ;;  %v643_v49 = vld [vmem:[%s4248_s20 + $0x770] sm:$0xff] }
  0xef   : > { %2207 = vmatpush2.bf16.msra.mxu1 %v3684_v63  ;;  %v3630_v63 = vcombine.low %v567_v50, %v571_v51  ;;  %v3710_v51 = vcombine.low %v647_v40, %v651_v41 }
  0xf0   : > { %2208 = vmatprep.subr.bf16.mxu1 %v3677_v1  ;;  %v3623_v1 = vcombine.high %v559_v60, %v563_v61 }
  0xf1   : > { %2156 = vmatpush2.bf16.msra.mxu0 %v3548_v6  ;;  %v3494_v6 = vcombine.low %v431_v57, %v435_v58  ;;  %v631_v57 = vld [vmem:[%s4248_s20 + $0x710] sm:$0xff] }
  0xf2   : > { %2157 = vmatprep.subr.bf16.mxu0 %v3541_v8  ;;  %v3487_v8 = vcombine.high %v423_v2, %v427_v3  ;;  %v635_v58 = vld [vmem:[%s4248_s20 + $0x730] sm:$0xff] }
  0xf3   : > { %2209 = vmatpush2.bf16.msra.mxu1 %v3676_v7  ;;  %v3622_v7 = vcombine.low %v559_v60, %v563_v61  ;;  %v3702_v61 = vcombine.low %v639_v48, %v643_v49  ;;  %v623_v2 = vld [vmem:[%s4248_s20 + $0x6d0] sm:$0xff] }
  0xf4   : > { %2210 = vmatprep.subr.bf16.mxu1 %v3669_v9  ;;  %v3615_v9 = vcombine.high %v551_v4, %v555_v5  ;;  %v627_v3 = vld [vmem:[%s4248_s20 + $0x6f0] sm:$0xff] }
  0xf5   : > { %2158 = vmatpush2.bf16.msra.mxu0 %v3540_v16  ;;  %v3479_v16 = vcombine.high %v415_v10, %v419_v11  ;;  %v615_v10 = vld [vmem:[%s4248_s20 + $0x690] sm:$0xff] }
  0xf6   : > { %2159 = vmatprep.subr.bf16.mxu0 %v3533_v18  ;;  %v407_v18 = vld [vmem:[%s4248_s20 + $0x10] sm:$0xff] }
  0xf7   : > { %2211 = vmatpush2.bf16.msra.mxu1 %v3668_v17  ;;  %v619_v11 = vld [vmem:[%s4248_s20 + $0x6b0] sm:$0xff] }
  0xf8   : > { %2212 = vmatprep.subr.bf16.mxu1 %v3661_v19  ;;  %v411_v19 = vld [vmem:[%s4248_s20 + $0x30] sm:$0xff] }
  0xf9   : > { %2160 = vmatpush2.bf16.msra.mxu0 %v3532_v26  ;;  %v3471_v26 = vcombine.high %v407_v18, %v411_v19  ;;  %v3470_v32 = vcombine.low %v407_v18, %v411_v19  ;;  %v607_v18 = vld [vmem:[%s4248_s20 + $0x650] sm:$0xff] }
  0xfa   : > { %2235 = vmatprep.subr.bf16.mxu0 %v3527_v28  ;;  %v527_v28 = vld [vmem:[%s4248_s20 + $0x3d0] sm:$0xff] }
  0xfb   : > { %2213 = vmatpush2.bf16.msra.mxu1 %v3660_v27  ;;  %v3599_v27 = vcombine.high %v535_v20, %v539_v21  ;;  %v611_v19 = vld [vmem:[%s4248_s20 + $0x670] sm:$0xff]  ;;  %v3678_v21 = vcombine.low %v615_v10, %v619_v11 }
  0xfc   : > { %2288 = vmatprep.subr.bf16.mxu1 %v3655_v29  ;;  %2162 = vmatmul.mubr.bf16.vlgmr.msra.gmra.mxu0 %v4354_v12  ;;  %v531_v29 = vld [vmem:[%s4248_s20 + $0x3f0] sm:$0xff] }
  0xfd   : > { %2236 = vmatpush1.bf16.msra.mxu0 %v3526_v35  ;;  %2171 = vmatprep.mubr.bf16.mxu0 %v4368_v22  ;;  %v3591_v35 = vcombine.high %v527_v28, %v531_v29  ;;  %v3590_v42 = vcombine.low %v527_v28, %v531_v29  ;;  %v599_v28 = vld [vmem:[%s4248_s20 + $0x610] sm:$0xff] }
  0xfe   : > { %2215 = vmatmul.mubr.bf16.vlgmr.msra.gmra.mxu1 %v4361_v15  ;;  %2237 = vmatprep.subr.bf16.mxu0 %v3519_v38  ;;  %v519_v38 = vld [vmem:[%s4248_s20 + $0x390] sm:$0xff] }
  0xff   : > { %2289 = vmatpush1.bf16.msra.mxu1 %v3654_v37  ;;  %2224 = vmatprep.mubr.bf16.mxu1 %v4376_v25  ;;  %v3719_v37 = vcombine.high %v655_v30, %v659_v31  ;;  %v603_v29 = vld [vmem:[%s4248_s20 + $0x630] sm:$0xff]  ;;  %v3670_v31 = vcombine.low %v607_v18, %v611_v19 }
 0x100   : > { %2290 = vmatprep.subr.bf16.mxu1 %v3647_v39  ;;  %v523_v39 = vld [vmem:[%s4248_s20 + $0x3b0] sm:$0xff] }
 0x101   : > { %2238 = vmatpush1.bf16.msra.mxu0 %v3518_v44  ;;  %v3583_v44 = vcombine.high %v519_v38, %v523_v39  ;;  %v3582_v50 = vcombine.low %v519_v38, %v523_v39  ;;  %v592_v38 = vld [vmem:[%s4248_s20 + $0x5d8] sm:$0xff] }
 0x102   : > { %2239 = vmatprep.subr.bf16.mxu0 %v3511_v46  ;;  %v511_v46 = vld [vmem:[%s4248_s20 + $0x350] sm:$0xff]  ;;  %v596_v39 = vld [vmem:[%s4248_s20 + $0x5f8] sm:$0xff] }
 0x103   : > { %2291 = vmatpush1.bf16.msra.mxu1 %v3646_v45  ;;  %v3711_v45 = vcombine.high %v647_v40, %v651_v41  ;;  %v3662_v41 = vcombine.low %v599_v28, %v603_v29 }
 0x104   : > { %2292 = vmatprep.subr.bf16.mxu1 %v3639_v47  ;;  %2172 = vmatmul.mubr.bf16.gmra.mxu0 %v4387_v34  ;;  %v515_v47 = vld [vmem:[%s4248_s20 + $0x370] sm:$0xff] }
 0x105   : > { %2240 = vmatpush1.bf16.msra.mxu0 %v3510_v52  ;;  %2267 = vmatprep.mubr.bf16.mxu0 %v4302_v56  ;;  %v547_v56 = vld [vmem:[%s4248_s20 + $0x470] sm:$0xff]  ;;  %v3575_v52 = vcombine.high %v511_v46, %v515_v47  ;;  %v3574_v60 = vcombine.low %v511_v46, %v515_v47  ;;  %v584_v46 = vld [vmem:[%s4248_s20 + $0x598] sm:$0xff] }
 0x106   : > { %2225 = vmatmul.mubr.bf16.gmra.mxu1 %v4393_v36  ;;  %2241 = vmatprep.subr.bf16.mxu0 %v3503_v54  ;;  %v3607_v17 = vcombine.high %v543_v13, %v547_v56  ;;  %v3606_v24 = vcombine.low %v543_v13, %v547_v56  ;;  %v503_v54 = vld [vmem:[%s4248_s20 + $0x310] sm:$0xff]  ;;  %v3686_v56 = vcombine.low %v623_v2, %v627_v3  ;;  %v588_v47 = vld [vmem:[%s4248_s20 + $0x5b8] sm:$0xff] }
 0x107   : > { %2293 = vmatpush1.bf16.msra.mxu1 %v3638_v53  ;;  %2320 = vmatprep.mubr.bf16.mxu1 %v4309_v59  ;;  %v3614_v59 = vcombine.low %v551_v4, %v555_v5  ;;  %v3703_v53 = vcombine.high %v639_v48, %v643_v49  ;;  %v3694_v5 = vcombine.low %v631_v57, %v635_v58 }
 0x108   : > { %2294 = vmatprep.subr.bf16.mxu1 %v3631_v55  ;;  %v507_v55 = vld [vmem:[%s4248_s20 + $0x330] sm:$0xff]  ;;  %v3656_v49 = vcombine.low %v592_v38, %v596_v39 }
 0x109   : > { %2242 = vmatpush1.bf16.msra.mxu0 %v3502_v62  ;;  %v3567_v62 = vcombine.high %v503_v54, %v507_v55  ;;  %v3566_v4 = vcombine.low %v503_v54, %v507_v55  ;;  %v576_v54 = vld [vmem:[%s4248_s20 + $0x558] sm:$0xff] }
 0x10a   : > { %2243 = vmatprep.subr.bf16.mxu0 %v3495_v0  ;;  %v495_v0 = vld [vmem:[%s4248_s20 + $0x2d0] sm:$0xff]  ;;  %v580_v55 = vld [vmem:[%s4248_s20 + $0x578] sm:$0xff] }
 0x10b   : > { %2295 = vmatpush1.bf16.msra.mxu1 %v3630_v63  ;;  %v3695_v63 = vcombine.high %v631_v57, %v635_v58  ;;  %v3648_v58 = vcombine.low %v584_v46, %v588_v47 }
 0x10c   : > { %2296 = vmatprep.subr.bf16.mxu1 %v3623_v1  ;;  %v499_v1 = vld [vmem:[%s4248_s20 + $0x2f0] sm:$0xff] }
 0x10d   : > { %2244 = vmatpush1.bf16.msra.mxu0 %v3494_v6  ;;  %v3559_v6 = vcombine.high %v495_v0, %v499_v1  ;;  %v3558_v13 = vcombine.low %v495_v0, %v499_v1  ;;  %v572_v0 = vld [vmem:[%s4248_s20 + $0x538] sm:$0xff]  ;;  %v3640_v1 = vcombine.low %v576_v54, %v580_v55 }
 0x10e   : > { %2245 = vmatprep.subr.bf16.mxu0 %v3487_v8  ;;  %v487_v8 = vld [vmem:[%s4248_s20 + $0x290] sm:$0xff] }
 0x10f   : > { %2297 = vmatpush1.bf16.msra.mxu1 %v3622_v7  ;;  %v3687_v7 = vcombine.high %v623_v2, %v627_v3 }
 0x110   : > { %2298 = vmatprep.subr.bf16.mxu1 %v3615_v9  ;;  %v491_v9 = vld [vmem:[%s4248_s20 + $0x2b0] sm:$0xff] }
 0x111   : > { %2246 = vmatpush1.bf16.msra.mxu0 %v3486_v14  ;;  %v3551_v14 = vcombine.high %v487_v8, %v491_v9  ;;  %v3550_v20 = vcombine.low %v487_v8, %v491_v9 }
 0x112   : > { %2247 = vmatprep.subr.bf16.mxu0 %v3479_v16  ;;  %v479_v16 = vld [vmem:[%s4248_s20 + $0x250] sm:$0xff] }
 0x113   : > { %2299 = vmatpush1.bf16.msra.mxu1 %v3614_v59  ;;  %v3679_v59 = vcombine.high %v615_v10, %v619_v11  ;;  %v424_v10 = vld [vmem:[%s4248_s20 + $0x98] sm:$0xff] }
 0x114   : > { %2300 = vmatprep.subr.bf16.mxu1 %v3607_v17  ;;  %v483_v17 = vld [vmem:[%s4248_s20 + $0x270] sm:$0xff]  ;;  %v428_v11 = vld [vmem:[%s4248_s20 + $0xb8] sm:$0xff] }
 0x115   : > { %2248 = vmatpush1.bf16.msra.mxu0 %v3478_v23  ;;  %v3543_v23 = vcombine.high %v479_v16, %v483_v17  ;;  %v3542_v30 = vcombine.low %v479_v16, %v483_v17  ;;  %v3489_v16 = vcombine.high %v424_v10, %v428_v11 }
 0x116   : > { %2249 = vmatprep.subr.bf16.mxu0 %v3471_v26  ;;  %v471_v26 = vld [vmem:[%s4248_s20 + $0x210] sm:$0xff] }
 0x117   : > { %2301 = vmatpush1.bf16.msra.mxu1 %v3606_v24  ;;  %v3671_v24 = vcombine.high %v607_v18, %v611_v19  ;;  %v416_v18 = vld [vmem:[%s4248_s20 + $0x58] sm:$0xff] }
 0x118   : > { %2302 = vmatprep.subr.bf16.mxu1 %v3599_v27  ;;  %v475_v27 = vld [vmem:[%s4248_s20 + $0x230] sm:$0xff]  ;;  %v420_v19 = vld [vmem:[%s4248_s20 + $0x78] sm:$0xff] }
 0x119   : > { %2250 = vmatpush1.bf16.msra.mxu0 %v3470_v32  ;;  %v3535_v32 = vcombine.high %v471_v26, %v475_v27  ;;  %v3534_v40 = vcombine.low %v471_v26, %v475_v27  ;;  %v3481_v26 = vcombine.high %v416_v18, %v420_v19 }
 0x11a   : > { %2251 = vmatprep.subr.bf16.mxu0 %v3591_v35  ;;  %v464_v35 = vld [vmem:[%s4248_s20 + $0x1d8] sm:$0xff] }
 0x11b   : > { %2303 = vmatpush1.bf16.msra.mxu1 %v3598_v33  ;;  %v3663_v33 = vcombine.high %v599_v28, %v603_v29  ;;  %v408_v28 = vld [vmem:[%s4248_s20 + $0x18] sm:$0xff] }
 0x11c   : > { %2304 = vmatprep.subr.bf16.mxu1 %v3719_v37  ;;  %v468_v37 = vld [vmem:[%s4248_s20 + $0x1f8] sm:$0xff] }
 0x11d   : > { %2252 = vmatpush2.bf16.msra.mxu0 %v3590_v42  ;;  %v3529_v42 = vcombine.high %v464_v35, %v468_v37  ;;  %v3528_v48 = vcombine.low %v464_v35, %v468_v37  ;;  %v412_v29 = vld [vmem:[%s4248_s20 + $0x38] sm:$0xff] }
 0x11e   : > { %2253 = vmatprep.subr.bf16.mxu0 %v3583_v44  ;;  %v456_v44 = vld [vmem:[%s4248_s20 + $0x198] sm:$0xff]  ;;  %v3473_v35 = vcombine.high %v408_v28, %v412_v29 }
 0x11f   : > { %2305 = vmatpush2.bf16.msra.mxu1 %v3718_v43  ;;  %v3657_v43 = vcombine.high %v592_v38, %v596_v39  ;;  %v528_v38 = vld [vmem:[%s4248_s20 + $0x3d8] sm:$0xff] }
 0x120   : > { %2306 = vmatprep.subr.bf16.mxu1 %v3711_v45  ;;  %v460_v45 = vld [vmem:[%s4248_s20 + $0x1b8] sm:$0xff] }
 0x121   : > { %2254 = vmatpush2.bf16.msra.mxu0 %v3582_v50  ;;  %v3521_v50 = vcombine.high %v456_v44, %v460_v45  ;;  %v3520_v57 = vcombine.low %v456_v44, %v460_v45  ;;  %v532_v39 = vld [vmem:[%s4248_s20 + $0x3f8] sm:$0xff] }
 0x122   : > { %2255 = vmatprep.subr.bf16.mxu0 %v3575_v52  ;;  %v448_v52 = vld [vmem:[%s4248_s20 + $0x158] sm:$0xff]  ;;  %v3593_v44 = vcombine.high %v528_v38, %v532_v39 }
 0x123   : > { %2307 = vmatpush2.bf16.msra.mxu1 %v3710_v51  ;;  %v3649_v51 = vcombine.high %v584_v46, %v588_v47  ;;  %v520_v46 = vld [vmem:[%s4248_s20 + $0x398] sm:$0xff] }
 0x124   : > { %2308 = vmatprep.subr.bf16.mxu1 %v3703_v53  ;;  %v452_v53 = vld [vmem:[%s4248_s20 + $0x178] sm:$0xff] }
 0x125   : > { %2256 = vmatpush2.bf16.msra.mxu0 %v3574_v60  ;;  %v3513_v60 = vcombine.high %v448_v52, %v452_v53  ;;  %v524_v47 = vld [vmem:[%s4248_s20 + $0x3b8] sm:$0xff] }
 0x126   : > { %2257 = vmatprep.subr.bf16.mxu0 %v3567_v62  ;;  %v440_v62 = vld [vmem:[%s4248_s20 + $0x118] sm:$0xff] }
 0x127   : > { %2309 = vmatpush2.bf16.msra.mxu1 %v3702_v61  ;;  %v3641_v61 = vcombine.high %v576_v54, %v580_v55  ;;  %v512_v54 = vld [vmem:[%s4248_s20 + $0x358] sm:$0xff] }
 0x128   : > { %2310 = vmatprep.subr.bf16.mxu1 %v3695_v63  ;;  %v444_v63 = vld [vmem:[%s4248_s20 + $0x138] sm:$0xff] }
 0x129   : > { %2258 = vmatpush2.bf16.msra.mxu0 %v3566_v4  ;;  %v3505_v2 = vcombine.high %v440_v62, %v444_v63  ;;  %v432_v4 = vld [vmem:[%s4248_s20 + $0xd8] sm:$0xff] }
 0x12a   : > { %2259 = vmatprep.subr.bf16.mxu0 %v3559_v6  ;;  %v560_v6 = vld [vmem:[%s4248_s20 + $0x4d8] sm:$0xff] }
 0x12b   : > { %2311 = vmatpush2.bf16.msra.mxu1 %v3694_v5  ;;  %v436_v5 = vld [vmem:[%s4248_s20 + $0xf8] sm:$0xff] }
 0x12c   : > { %2312 = vmatprep.subr.bf16.mxu1 %v3687_v7  ;;  %v564_v7 = vld [vmem:[%s4248_s20 + $0x4f8] sm:$0xff]  ;;  %v3497_v8 = vcombine.high %v432_v4, %v436_v5 }
 0x12d   : > { %2260 = vmatpush2.bf16.msra.mxu0 %v3558_v13  ;;  %v3625_v9 = vcombine.high %v560_v6, %v564_v7  ;;  %v3895_v13 = vld [vmem:[%s4915_s1 + $0x4] ss:$16 sps:$4 sm:$0xff]   ;;  %v516_v55 = vld [vmem:[%s4248_s20 + $0x378] sm:$0xff] }
 0x12e   : > { %2261 = vmatprep.subr.bf16.mxu0 %v3551_v14  ;;  %v3496_v14 = vcombine.low %v432_v4, %v436_v5 }
 0x12f   : > { %2313 = vmatpush2.bf16.msra.mxu1 %v3686_v56  ;;  %v556_v56 = vld [vmem:[%s4248_s20 + $0x4b8] sm:$0xff] }
 0x130   : > { %2314 = vmatprep.subr.bf16.mxu1 %v3679_v59  ;;  %v3624_v59 = vcombine.low %v560_v6, %v564_v7  ;;  %v496_v6 = vld [vmem:[%s4248_s20 + $0x2d8] sm:$0xff] }
 0x131   : > { %2262 = vmatpush2.bf16.msra.mxu0 %v3550_v20  ;;  %v544_v20 = vld [vmem:[%s4248_s20 + $0x458] sm:$0xff] }
 0x132   : > { %2263 = vmatprep.subr.bf16.mxu0 %v3543_v23  ;;  %v3488_v23 = vcombine.low %v424_v10, %v428_v11  ;;  %v500_v7 = vld [vmem:[%s4248_s20 + $0x2f8] sm:$0xff] }
 0x133   : > { %2315 = vmatpush2.bf16.msra.mxu1 %v3678_v21  ;;  %v548_v21 = vld [vmem:[%s4248_s20 + $0x478] sm:$0xff]  ;;  %v3561_v10 = vcombine.high %v496_v6, %v500_v7 }
 0x134   : > { %2316 = vmatprep.subr.bf16.mxu1 %v3671_v24  ;;  %v3609_v27 = vcombine.high %v544_v20, %v548_v21 }
 0x135   : > { %2264 = vmatpush2.bf16.msra.mxu0 %v3542_v30  ;;  %v536_v30 = vld [vmem:[%s4248_s20 + $0x418] sm:$0xff] }
 0x136   : > { %2265 = vmatprep.subr.bf16.mxu0 %v3535_v32  ;;  %v3480_v32 = vcombine.low %v416_v18, %v420_v19  ;;  %v480_v18 = vld [vmem:[%s4248_s20 + $0x258] sm:$0xff] }
 0x137   : > { %2317 = vmatpush2.bf16.msra.mxu1 %v3670_v31  ;;  %v540_v31 = vld [vmem:[%s4248_s20 + $0x438] sm:$0xff] }
 0x138   : > { %2318 = vmatprep.subr.bf16.mxu1 %v3663_v33  ;;  %v3608_v33 = vcombine.low %v544_v20, %v548_v21  ;;  %v3601_v37 = vcombine.high %v536_v30, %v540_v31  ;;  %v484_v19 = vld [vmem:[%s4248_s20 + $0x278] sm:$0xff] }
 0x139   : > { %2266 = vmatpush2.bf16.msra.mxu0 %v3534_v40  ;;  %v656_v40 = vld [vmem:[%s4248_s20 + $0x7d8] sm:$0xff] }
 0x13a   : > { %2341 = vmatprep.subr.bf16.mxu0 %v3529_v42  ;;  %v3472_v42 = vcombine.low %v408_v28, %v412_v29  ;;  %v608_v20 = vld [vmem:[%s4248_s20 + $0x658] sm:$0xff] }
 0x13b   : > { %2319 = vmatpush2.bf16.msra.mxu1 %v3662_v41  ;;  %v660_v41 = vld [vmem:[%s4248_s20 + $0x7f8] sm:$0xff] }
 0x13c   : > { %2394 = vmatprep.subr.bf16.mxu1 %v3657_v43  ;;  %2268 = vmatmul.mubr.bf16.vlgmr.msra.gmra.mxu0 %v4354_v12  ;;  %v568_v12 = vld [vmem:[%s4248_s20 + $0x518] sm:$0xff]  ;;  %v3600_v43 = vcombine.low %v536_v30, %v540_v31  ;;  %v3721_v45 = vcombine.high %v656_v40, %v660_v41 }
 0x13d   : > { %2342 = vmatpush1.bf16.msra.mxu0 %v3528_v48  ;;  %2277 = vmatprep.mubr.bf16.mxu0 %v4368_v22  ;;  %v3633_v3 = vcombine.high %v568_v12, %v572_v0  ;;  %v3504_v22 = vcombine.low %v440_v62, %v444_v63  ;;  %v648_v48 = vld [vmem:[%s4248_s20 + $0x798] sm:$0xff]  ;;  %v3577_v62 = vcombine.high %v512_v54, %v516_v55 }
 0x13e   : > { %2321 = vmatmul.mubr.bf16.vlgmr.msra.gmra.mxu1 %v4361_v15  ;;  %2343 = vmatprep.subr.bf16.mxu0 %v3521_v50  ;;  %v3512_v15 = vcombine.low %v448_v52, %v452_v53  ;;  %v3592_v50 = vcombine.low %v528_v38, %v532_v39  ;;  %v3585_v52 = vcombine.high %v520_v46, %v524_v47  ;;  %v612_v21 = vld [vmem:[%s4248_s20 + $0x678] sm:$0xff] }
 0x13f   : > { %2395 = vmatpush1.bf16.msra.mxu1 %v3656_v49  ;;  %2330 = vmatprep.mubr.bf16.mxu1 %v4376_v25  ;;  %v3632_v25 = vcombine.low %v568_v12, %v572_v0  ;;  %v652_v49 = vld [vmem:[%s4248_s20 + $0x7b8] sm:$0xff] }
 0x140   : > { %2396 = vmatprep.subr.bf16.mxu1 %v3649_v51  ;;  %v3720_v51 = vcombine.low %v656_v40, %v660_v41  ;;  %v3713_v53 = vcombine.high %v648_v48, %v652_v49  ;;  %v504_v12 = vld [vmem:[%s4248_s20 + $0x318] sm:$0xff]  ;;  %v3897_v40 = vld [vmem:[%s4915_s1] ss:$16 sps:$4 sm:$0xff]  }
 0x141   : > { %2344 = vmatpush1.bf16.msra.mxu0 %v3520_v57  ;;  %v640_v57 = vld [vmem:[%s4248_s20 + $0x758] sm:$0xff] }
 0x142   : > { %2345 = vmatprep.subr.bf16.mxu0 %v3513_v60  ;;  %v3584_v60 = vcombine.low %v520_v46, %v524_v47  ;;  %v508_v0 = vld [vmem:[%s4248_s20 + $0x338] sm:$0xff] }
 0x143   : > { %2397 = vmatpush1.bf16.msra.mxu1 %v3648_v58  ;;  %v644_v58 = vld [vmem:[%s4248_s20 + $0x778] sm:$0xff]  ;;  %v3569_v4 = vcombine.high %v504_v12, %v508_v0 }
 0x144   : > { %2398 = vmatprep.subr.bf16.mxu1 %v3641_v61  ;;  %2278 = vmatmul.mubr.bf16.gmra.mxu0 %v4387_v34  ;;  %v552_v34 = vld [vmem:[%s4248_s20 + $0x498] sm:$0xff]  ;;  %v3712_v61 = vcombine.low %v648_v48, %v652_v49  ;;  %v3705_v63 = vcombine.high %v640_v57, %v644_v58  ;;  %v663_v48 = vlaneseq }
 0x145   : > { %2346 = vmatpush1.bf16.msra.mxu0 %v3512_v15  ;;  %2373 = vmatprep.mubr.bf16.mxu0 %v3895_v13  ;;  %v3617_v17 = vcombine.high %v552_v34, %v556_v56  ;;  %v3616_v24 = vcombine.low %v552_v34, %v556_v56  ;;  %v632_v15 = vld [vmem:[%s4248_s20 + $0x718] sm:$0xff] }
 0x146   : > { %2331 = vmatmul.mubr.bf16.gmra.mxu1 %v4393_v36  ;;  %2347 = vmatprep.subr.bf16.mxu0 %v3505_v2  ;;  %v3896_v36 = vld [vmem:[%s4915_s1 + $0xc] ss:$16 sps:$4 sm:$0xff]   ;;  %v3576_v2 = vcombine.low %v512_v54, %v516_v55  ;;  %v3898_v41 = vld [vmem:[%s4915_s1 + $0x8] ss:$16 sps:$4 sm:$0xff]   ;;  %v4629_v55 = vld [vmem:[%s375_s5] sm:$0xff] }
 0x147   : > { %2399 = vmatpush1.bf16.msra.mxu1 %v3640_v1  ;;  %2426 = vmatprep.mubr.bf16.mxu1 %v3896_v36  ;;  %v636_v1 = vld [vmem:[%s4248_s20 + $0x738] sm:$0xff] }
 0x148   : > { %2400 = vmatprep.subr.bf16.mxu1 %v3633_v3  ;;  %v3704_v3 = vcombine.low %v640_v57, %v644_v58  ;;  %v3697_v5 = vcombine.high %v632_v15, %v636_v1  ;;  %v488_v13 = vld [vmem:[%s4248_s20 + $0x298] sm:$0xff] }
 0x149   : > { %2348 = vmatpush1.bf16.msra.mxu0 %v3504_v22  ;;  %v624_v22 = vld [vmem:[%s4248_s20 + $0x6d8] sm:$0xff] }
 0x14a   : > { %2349 = vmatprep.subr.bf16.mxu0 %v3497_v8  ;;  %v3568_v8 = vcombine.low %v504_v12, %v508_v0  ;;  %v492_v34 = vld [vmem:[%s4248_s20 + $0x2b8] sm:$0xff] }
 0x14b   : > { %2401 = vmatpush1.bf16.msra.mxu1 %v3632_v25  ;;  %v628_v25 = vld [vmem:[%s4248_s20 + $0x6f8] sm:$0xff] }
 0x14c   : > { %2402 = vmatprep.subr.bf16.mxu1 %v3625_v9  ;;  %v3696_v9 = vcombine.low %v632_v15, %v636_v1  ;;  %v3689_v11 = vcombine.high %v624_v22, %v628_v25  ;;  %v616_v56 = vld [vmem:[%s4248_s20 + $0x698] sm:$0xff] }
 0x14d   : > { %2350 = vmatpush1.bf16.msra.mxu0 %v3496_v14  ;;  %v620_v36 = vld [vmem:[%s4248_s20 + $0x6b8] sm:$0xff]  ;;  %v3560_v14 = vcombine.low %v496_v6, %v500_v7 }
 0x14e   : > { %2351 = vmatprep.subr.bf16.mxu0 %v3489_v16  ;;  %v3553_v16 = vcombine.high %v488_v13, %v492_v34  ;;  %v472_v28 = vld [vmem:[%s4248_s20 + $0x218] sm:$0xff] }
 0x14f   : > { %2403 = vmatpush1.bf16.msra.mxu1 %v3624_v59  ;;  %v3688_v59 = vcombine.low %v624_v22, %v628_v25  ;;  %v476_v29 = vld [vmem:[%s4248_s20 + $0x238] sm:$0xff] }
 0x150   : > { %2404 = vmatprep.subr.bf16.mxu1 %v3617_v17  ;;  %v3681_v17 = vcombine.high %v616_v56, %v620_v36  ;;  %v600_v30 = vld [vmem:[%s4248_s20 + $0x618] sm:$0xff]  ;;  %v3536_v38 = vcombine.low %v472_v28, %v476_v29 }
 0x151   : > { %2352 = vmatpush1.bf16.msra.mxu0 %v3488_v23  ;;  %v3552_v23 = vcombine.low %v488_v13, %v492_v34  ;;  %v604_v31 = vld [vmem:[%s4248_s20 + $0x638] sm:$0xff] }
 0x152   : > { %2353 = vmatprep.subr.bf16.mxu0 %v3481_v26  ;;  %v3545_v26 = vcombine.high %v480_v18, %v484_v19  ;;  %v3664_v39 = vcombine.low %v600_v30, %v604_v31 }
 0x153   : > { %2405 = vmatpush1.bf16.msra.mxu1 %v3616_v24  ;;  %v3680_v24 = vcombine.low %v616_v56, %v620_v36 }
 0x154   : > { %2406 = vmatprep.subr.bf16.mxu1 %v3609_v27  ;;  %v3673_v27 = vcombine.high %v608_v20, %v612_v21 }
 0x155   : > { %2354 = vmatpush1.bf16.msra.mxu0 %v3480_v32  ;;  %v3544_v32 = vcombine.low %v480_v18, %v484_v19 }
 0x156   : > { %2355 = vmatprep.subr.bf16.mxu0 %v3473_v35  ;;  %v3537_v35 = vcombine.high %v472_v28, %v476_v29 }
 0x157   : > { %2407 = vmatpush1.bf16.msra.mxu1 %v3608_v33  ;;  %v3672_v33 = vcombine.low %v608_v20, %v612_v21 }
 0x158   : > { %2408 = vmatprep.subr.bf16.mxu1 %v3601_v37  ;;  %v3665_v37 = vcombine.high %v600_v30, %v604_v31 }
 0x159   : > { %2356 = vmatpush1.bf16.msra.mxu0 %v3472_v42  ;;  %v3899_v42 = vld [vmem:[%s4915_s1 + $0x24] ss:$16 sps:$4 sm:$0xff]  }
 0x15a   : > { %2357 = vmatprep.subr.bf16.mxu0 %v3593_v44  ;;  %v3901_v44 = vld [vmem:[%s4915_s1 + $0x20] ss:$16 sps:$4 sm:$0xff]  }
 0x15b   : > { %2409 = vmatpush1.bf16.msra.mxu1 %v3600_v43  ;;  %v3900_v43 = vld [vmem:[%s4915_s1 + $0x2c] ss:$16 sps:$4 sm:$0xff]  }
 0x15c   : > { %2410 = vmatprep.subr.bf16.mxu1 %v3721_v45  ;;  %v3902_v45 = vld [vmem:[%s4915_s1 + $0x28] ss:$16 sps:$4 sm:$0xff]  }
 0x15d   : > { %2358 = vmatpush2.bf16.msra.mxu0 %v3592_v50 }
 0x15e   : > { %2359 = vmatprep.subr.bf16.mxu0 %v3585_v52 }
 0x15f   : > { %2411 = vmatpush2.bf16.msra.mxu1 %v3720_v51  ;;  %v4619_v51 = vshrl.u32 %v663_v48, 7 }
 0x160   : > { %2412 = vmatprep.subr.bf16.mxu1 %v3713_v53 }
 0x161   : > { %2360 = vmatpush2.bf16.msra.mxu0 %v3584_v60  ;;  %v4627_v54 = vsub.s32 0, %v4619_v51  ;;  %v4632_v57 = vsub.s32 1, %v4619_v51 }
 0x162   : > { %2361 = vmatprep.subr.bf16.mxu0 %v3577_v62 }
 0x163   : > { %2413 = vmatpush2.bf16.msra.mxu1 %v3712_v61  ;;  %v666_v61 = vrot.slane %v4629_v55, %v4627_v54 }
 0x164   : > { %2414 = vmatprep.subr.bf16.mxu1 %v3705_v63  ;;  %v670_v63 = vrot.slane %v4629_v55, %v4632_v57 }
 0x165   : > { %2362 = vmatpush2.bf16.msra.mxu0 %v3576_v2 }
 0x166   : > { %2363 = vmatprep.subr.bf16.mxu0 %v3569_v4 }
 0x167   : > { %2415 = vmatpush2.bf16.msra.mxu1 %v3704_v3  ;;  %v673_v3 = vsub.s32 2, %v4619_v51 }
 0x168   : > { %2416 = vmatprep.subr.bf16.mxu1 %v3697_v5 }
 0x169   : > { %2364 = vmatpush2.bf16.msra.mxu0 %v3568_v8  ;;  %v677_v8 = vsub.s32 3, %v4619_v51 }
 0x16a   : > { %2365 = vmatprep.subr.bf16.mxu0 %v3561_v10  ;;  %v674_v10 = vrot.slane %v4629_v55, %v673_v3 }
 0x16b   : > { %2417 = vmatpush2.bf16.msra.mxu1 %v3696_v9 }
 0x16c   : > { %2418 = vmatprep.subr.bf16.mxu1 %v3689_v11 }
 0x16d   : > { %2366 = vmatpush2.bf16.msra.mxu0 %v3560_v14  ;;  %v678_v14 = vrot.slane %v4629_v55, %v677_v8 }
 0x16e   : > { %2367 = vmatprep.subr.bf16.mxu0 %v3553_v16 }
 0x16f   : > { %2419 = vmatpush2.bf16.msra.mxu1 %v3688_v59 }
 0x170   : > { %2420 = vmatprep.subr.bf16.mxu1 %v3681_v17 }
 0x171   : > { %2368 = vmatpush2.bf16.msra.mxu0 %v3552_v23 }
 0x172   : > { %2369 = vmatprep.subr.bf16.mxu0 %v3545_v26 }
 0x173   : > { %2421 = vmatpush2.bf16.msra.mxu1 %v3680_v24 }
 0x174   : > { %2422 = vmatprep.subr.bf16.mxu1 %v3673_v27 }
 0x175   : > { %2370 = vmatpush2.bf16.msra.mxu0 %v3544_v32 }
 0x176   : > { %2371 = vmatprep.subr.bf16.mxu0 %v3537_v35 }
 0x177   : > { %2423 = vmatpush2.bf16.msra.mxu1 %v3672_v33 }
 0x178   : > { %2424 = vmatprep.subr.bf16.mxu1 %v3665_v37 }
 0x179   : > { %2372 = vmatpush2.bf16.msra.mxu0 %v3536_v38 }
 0x17b   : > { %2425 = vmatpush2.bf16.msra.mxu1 %v3664_v39 }
 0x17c   : > { %2374 = vmatmul.mubr.bf16.vlgmr.msra.gmra.mxu0 %v3897_v40  ;;  %v2057_v46 = vpop.f32.mrf.mxu0  ;;  %v4647_v40 = vld [vmem:[%s4255_s23] sm:$0xff] }
 0x17d   : > { %2383 = vmatprep.mubr.bf16.mxu0 %v3899_v42  ;;  %v2058_v0 = vadd.f32 %v2057_v46, %v666_v61  ;;  %v2484_v46 = vrot.slane %v4647_v40, %v4627_v54 }
 0x17e   : > { %2427 = vmatmul.mubr.bf16.vlgmr.msra.gmra.mxu1 %v3898_v41  ;;  %v2110_v47 = vpop.f32.mrf.mxu1  ;;  %v2059_v49 = vpop.f32.mrf.mxu0 }
 0x17f   : > { %2436 = vmatprep.mubr.bf16.mxu1 %v3900_v43  ;;  %v2060_v1 = vadd.f32 %v2059_v49, %v670_v63  ;;  %v2111_v4 = vadd.f32 %v2110_v47, %v2058_v0  ;;  %v2492_v0 = vrot.slane %v4647_v40, %v673_v3 }
 0x180   : > { %v2112_v50 = vpop.f32.mrf.mxu1  ;;  %v2061_v52 = vpop.f32.mrf.mxu0 }
 0x181   : > { %v2062_v5 = vadd.f32 %v2061_v52, %v666_v61  ;;  %v2113_v7 = vadd.f32 %v2112_v50, %v2060_v1  ;;  %3811 = vtanh.f32 %v2111_v4 }
 0x182   : > { %v2114_v53 = vpop.f32.mrf.mxu1  ;;  %v2063_v58 = vpop.f32.mrf.mxu0 }
 0x183   : > { %v2064_v22 = vadd.f32 %v2063_v58, %v670_v63  ;;  %v2115_v11 = vadd.f32 %v2114_v53, %v2062_v5  ;;  %3813 = vtanh.f32 %v2113_v7  ;;  %v2488_v53 = vrot.slane %v4647_v40, %v4632_v57 }
 0x184   : > { %2384 = vmatmul.mubr.bf16.gmra.mxu0 %v3901_v44  ;;  %v2116_v60 = vpop.f32.mrf.mxu1  ;;  %v2067_v62 = vpop.f32.mrf.mxu0 }
 0x185   : > { %v2068_v9 = vadd.f32 %v2067_v62, %v666_v61  ;;  %v2117_v56 = vadd.f32 %v2116_v60, %v2064_v22  ;;  %3815 = vtanh.f32 %v2115_v11 }
 0x186   : > { %2437 = vmatmul.mubr.bf16.gmra.mxu1 %v3902_v45  ;;  %v2120_v12 = vpop.f32.mrf.mxu1  ;;  %v2069_v15 = vpop.f32.mrf.mxu0 }
 0x187   : > { %v2070_v13 = vadd.f32 %v2069_v15, %v670_v63  ;;  %v2121_v59 = vadd.f32 %v2120_v12, %v2068_v9  ;;  %3817 = vtanh.f32 %v2117_v56  ;;  %v2496_v9 = vrot.slane %v4647_v40, %v677_v8 }
 0x188   : > { %v2122_v2 = vpop.f32.mrf.mxu1  ;;  %v2071_v6 = vpop.f32.mrf.mxu0 }
 0x189   : > { %v2072_v16 = vadd.f32 %v2071_v6, %v666_v61  ;;  %v2123_v20 = vadd.f32 %v2122_v2, %v2070_v13  ;;  %3819 = vtanh.f32 %v2121_v59 }
 0x18a   : > { %v2124_v25 = vpop.f32.mrf.mxu1  ;;  %v2073_v34 = vpop.f32.mrf.mxu0 }
 0x18b   : > { %v2074_v21 = vadd.f32 %v2073_v34, %v670_v63  ;;  %v2125_v28 = vadd.f32 %v2124_v25, %v2072_v16 }
 0x18c   : > { %v2126_v36 = vpop.f32.mrf.mxu1 }
 0x18d   : > { %v2127_v33 = vadd.f32 %v2126_v36, %v2074_v21 }
 0x18e   : > { %v3812_v47 = vpop.eup %3811 }
 0x18f   : > { %v2521_v15 = vmul.f32 %v3812_v47, %v2484_v46 }
 0x190   : > { %v3814_v58 = vpop.eup %3813 }
 0x191   : > { %v2522_v6 = vmul.f32 %v3814_v58, %v2488_v53 }
 0x192   : > { %v3816_v1 = vpop.eup %3815 }
 0x193   : > { %v2553_v3 = vadd.f32 %v2522_v6, %v2521_v15  ;;  %v2529_v16 = vmul.f32 %v3816_v1, %v2484_v46 }
 0x194   : > { %v3818_v7 = vpop.eup %3817 }
 0x195   : > { %v2530_v34 = vmul.f32 %v3818_v7, %v2488_v53 }
 0x196   : > { %v3820_v22 = vpop.eup %3819 }
 0x1bc   : > { %v2163_v17 = vpop.f32.mrf.mxu0 }
 0x1bd   : > { %v2164_v18 = vadd.f32 %v2163_v17, %v674_v10 }
 0x1be   : > { %v2216_v19 = vpop.f32.mrf.mxu1  ;;  %v2165_v23 = vpop.f32.mrf.mxu0 }
 0x1bf   : > { %v2217_v24 = vadd.f32 %v2216_v19, %v2164_v18  ;;  %v2166_v26 = vadd.f32 %v2165_v23, %v678_v14  ;;  %v2537_v18 = vmul.f32 %v3820_v22, %v2484_v46  ;;  %v689_v22 = vsub.s32 6, %v4619_v51 }
 0x1c0   : > { %v2218_v27 = vpop.f32.mrf.mxu1  ;;  %v2167_v29 = vpop.f32.mrf.mxu0 }
 0x1c1   : > { %3821 = vtanh.f32 %v2217_v24  ;;  %v2219_v30 = vadd.f32 %v2218_v27, %v2166_v26  ;;  %v2168_v31 = vadd.f32 %v2167_v29, %v674_v10  ;;  %v2558_v24 = vadd.f32 %v2530_v34, %v2529_v16 }
 0x1c2   : > { %v2220_v32 = vpop.f32.mrf.mxu1  ;;  %3823 = vtanh.f32 %v2123_v20  ;;  %v2169_v35 = vpop.f32.mrf.mxu0  ;;  %v693_v34 = vsub.s32 7, %v4619_v51 }
 0x1c3   : > { %3825 = vtanh.f32 %v2219_v30  ;;  %v2221_v37 = vadd.f32 %v2220_v32, %v2168_v31  ;;  %v2170_v38 = vadd.f32 %v2169_v35, %v678_v14 }
 0x1c4   : > { %v2222_v39 = vpop.f32.mrf.mxu1  ;;  %3827 = vtanh.f32 %v2125_v28  ;;  %v2173_v41 = vpop.f32.mrf.mxu0 }
 0x1c5   : > { %3829 = vtanh.f32 %v2221_v37  ;;  %v2223_v42 = vadd.f32 %v2222_v39, %v2170_v38  ;;  %v2174_v43 = vadd.f32 %v2173_v41, %v674_v10 }
 0x1c6   : > { %v2226_v44 = vpop.f32.mrf.mxu1  ;;  %3831 = vtanh.f32 %v2127_v33  ;;  %v2175_v45 = vpop.f32.mrf.mxu0 }
 0x1c7   : > { %3833 = vtanh.f32 %v2223_v42  ;;  %v2176_v49 = vadd.f32 %v2175_v45, %v678_v14  ;;  %v2227_v50 = vadd.f32 %v2226_v44, %v2174_v43 }
 0x1c8   : > { %v2228_v52 = vpop.f32.mrf.mxu1  ;;  %v2177_v60 = vpop.f32.mrf.mxu0 }
 0x1c9   : > { %3835 = vtanh.f32 %v2227_v50  ;;  %v2178_v61 = vadd.f32 %v2177_v60, %v674_v10  ;;  %v2229_v62 = vadd.f32 %v2228_v52, %v2176_v49 }
 0x1ca   : > { %v2230_v63 = vpop.f32.mrf.mxu1  ;;  %v2179_v12 = vpop.f32.mrf.mxu0 }
 0x1cb   : > { %3837 = vtanh.f32 %v2229_v62  ;;  %v2180_v2 = vadd.f32 %v2179_v12, %v678_v14  ;;  %v2231_v4 = vadd.f32 %v2230_v63, %v2178_v61  ;;  %v681_v61 = vsub.s32 4, %v4619_v51 }
 0x1cc   : > { %v2232_v5 = vpop.f32.mrf.mxu1  ;;  %v685_v62 = vsub.s32 5, %v4619_v51 }
 0x1cd   : > { %3839 = vtanh.f32 %v2231_v4  ;;  %v2233_v25 = vadd.f32 %v2232_v5, %v2180_v2 }
 0x1ce   : > { %v3822_v10 = vpop.eup %3821  ;;  %v686_v1 = vrot.slane %v4629_v55, %v685_v62 }
 0x1cf   : > { %v3824_v11 = vpop.eup %3823  ;;  %3841 = vtanh.f32 %v2233_v25  ;;  %v2523_v13 = vmul.f32 %v3822_v10, %v2492_v0 }
 0x1d0   : > { %v3826_v56 = vpop.eup %3825  ;;  %v2538_v19 = vmul.f32 %v3824_v11, %v2488_v53 }
 0x1d1   : > { %v3828_v36 = vpop.eup %3827  ;;  %v2524_v14 = vmul.f32 %v3826_v56, %v2496_v9  ;;  %v2554_v59 = vadd.f32 %v2553_v3, %v2523_v13 }
 0x1d2   : > { %v3830_v17 = vpop.eup %3829  ;;  %v2563_v29 = vadd.f32 %v2538_v19, %v2537_v18  ;;  %v2545_v32 = vmul.f32 %v3828_v36, %v2484_v46  ;;  %v690_v36 = vrot.slane %v4629_v55, %v689_v22  ;;  %v694_v19 = vrot.slane %v4629_v55, %v693_v34 }
 0x1d3   : > { %v3832_v20 = vpop.eup %3831  ;;  %v2555_v21 = vadd.f32 %v2554_v59, %v2524_v14  ;;  %v2531_v23 = vmul.f32 %v3830_v17, %v2492_v0 }
 0x1d4   : > { %v3834_v26 = vpop.eup %3833  ;;  %v2546_v33 = vmul.f32 %v3832_v20, %v2488_v53 }
 0x1d5   : > { %2556 = vadd.xlane.f32.xlu0 %v2555_v21  ;;  %v2532_v8 = vmul.f32 %v3834_v26, %v2496_v9  ;;  %v2559_v27 = vadd.f32 %v2558_v24, %v2531_v23 }
 0x1d6   : > { %v3836_v28 = vpop.eup %3835  ;;  %v2568_v43 = vadd.f32 %v2546_v33, %v2545_v32 }
 0x1d7   : > { %v2560_v30 = vadd.f32 %v2559_v27, %v2532_v8  ;;  %v2539_v31 = vmul.f32 %v3836_v28, %v2492_v0 }
 0x1d8   : > { %v3838_v35 = vpop.eup %3837 }
 0x1d9   : > { %2561 = vadd.xlane.f32.xlu0 %v2560_v30  ;;  %v2540_v37 = vmul.f32 %v3838_v35, %v2496_v9  ;;  %v2564_v38 = vadd.f32 %v2563_v29, %v2539_v31 }
 0x1da   : > { %v3840_v39 = vpop.eup %3839 }
 0x1db   : > { %v2565_v41 = vadd.f32 %v2564_v38, %v2540_v37  ;;  %v2547_v42 = vmul.f32 %v3840_v39, %v2492_v0  ;;  %v682_v0 = vrot.slane %v4629_v55, %v681_v61 }
 0x1dc   : > { %v3842_v44 = vpop.eup %3841 }
 0x1dd   : > { %2566 = vadd.xlane.f32.xlu1 %v2565_v41  ;;  %v2548_v45 = vmul.f32 %v3842_v44, %v2496_v9  ;;  %v2569_v47 = vadd.f32 %v2568_v43, %v2547_v42 }
 0x1df   : > { %v2570_v49 = vadd.f32 %v2569_v47, %v2548_v45 }
 0x1e1   : > { %2571 = vadd.xlane.f32.xlu1 %v2570_v49 }
 0x1fc   : > { %v2269_v50 = vpop.f32.mrf.mxu0 }
 0x1fd   : > { %v2270_v4 = vadd.f32 %v2269_v50, %v682_v0  ;;  %v2500_v50 = vrot.slane %v4647_v40, %v681_v61  ;;  %v2508_v61 = vrot.slane %v4647_v40, %v689_v22 }
 0x1fe   : > { %v2322_v52 = vpop.f32.mrf.mxu1  ;;  %v2271_v58 = vpop.f32.mrf.mxu0 }
 0x1ff   : > { %v2272_v6 = vadd.f32 %v2271_v58, %v686_v1  ;;  %v2323_v25 = vadd.f32 %v2322_v52, %v2270_v4 }
 0x200   : > { %v2324_v60 = vpop.f32.mrf.mxu1  ;;  %v2273_v46 = vpop.f32.mrf.mxu0 }
 0x201   : > { %v2274_v9 = vadd.f32 %v2273_v46, %v682_v0  ;;  %v2325_v11 = vadd.f32 %v2324_v60, %v2272_v6  ;;  %3843 = vtanh.f32 %v2323_v25  ;;  %v2504_v60 = vrot.slane %v4647_v40, %v685_v62 }
 0x202   : > { %v2326_v53 = vpop.f32.mrf.mxu1  ;;  %v2275_v63 = vpop.f32.mrf.mxu0 }
 0x203   : > { %v2276_v13 = vadd.f32 %v2275_v63, %v686_v1  ;;  %v2327_v14 = vadd.f32 %v2326_v53, %v2274_v9  ;;  %3845 = vtanh.f32 %v2325_v11 }
 0x204   : > { %v2328_v12 = vpop.f32.mrf.mxu1  ;;  %v2279_v15 = vpop.f32.mrf.mxu0 }
 0x205   : > { %v2280_v56 = vadd.f32 %v2279_v15, %v682_v0  ;;  %v2329_v17 = vadd.f32 %v2328_v12, %v2276_v13  ;;  %3847 = vtanh.f32 %v2327_v14 }
 0x206   : > { %v2332_v2 = vpop.f32.mrf.mxu1  ;;  %v2281_v5 = vpop.f32.mrf.mxu0 }
 0x207   : > { %v2282_v59 = vadd.f32 %v2281_v5, %v686_v1  ;;  %v2333_v20 = vadd.f32 %v2332_v2, %v2280_v56  ;;  %3849 = vtanh.f32 %v2329_v17 }
 0x208   : > { %v2334_v7 = vpop.f32.mrf.mxu1  ;;  %v2283_v10 = vpop.f32.mrf.mxu0 }
 0x209   : > { %v2284_v21 = vadd.f32 %v2283_v10, %v682_v0  ;;  %v2335_v8 = vadd.f32 %v2334_v7, %v2282_v59  ;;  %3851 = vtanh.f32 %v2333_v20 }
 0x20a   : > { %v2336_v3 = vpop.f32.mrf.mxu1  ;;  %v2285_v16 = vpop.f32.mrf.mxu0 }
 0x20b   : > { %v2286_v27 = vadd.f32 %v2285_v16, %v686_v1  ;;  %v2337_v32 = vadd.f32 %v2336_v3, %v2284_v21  ;;  %v2512_v3 = vrot.slane %v4647_v40, %v693_v34 }
 0x20c   : > { %v2338_v18 = vpop.f32.mrf.mxu1 }
 0x20d   : > { %v2339_v38 = vadd.f32 %v2338_v18, %v2286_v27 }
 0x20e   : > { %v3844_v58 = vpop.eup %3843 }
 0x20f   : > { %v2525_v5 = vmul.f32 %v3844_v58, %v2500_v50 }
 0x210   : > { %v3846_v12 = vpop.eup %3845 }
 0x211   : > { %v2526_v25 = vmul.f32 %v3846_v12, %v2504_v60 }
 0x212   : > { %v3848_v6 = vpop.eup %3847 }
 0x213   : > { %v2776_v14 = vadd.f32 %v2526_v25, %v2525_v5  ;;  %v2533_v20 = vmul.f32 %v3848_v6, %v2500_v50  ;;  %v4067_v6 = vmov 0  }
 0x214   : > { %v3850_v9 = vpop.eup %3849  ;;  %3798 = vset.pattern.permute.xlu1 %v4067_v6  ;;  %3797 = vset.pattern.permute.xlu0 %v4067_v6 }
 0x215   : > { %v2534_v59 = vmul.f32 %v3850_v9, %v2504_v60 }
 0x216   : > { %v3852_v11 = vpop.eup %3851 }
 0x23c   : > { %v2375_v23 = vpop.f32.mrf.mxu0 }
 0x23d   : > { %v2376_v24 = vadd.f32 %v2375_v23, %v690_v36  ;;  %v2541_v23 = vmul.f32 %v3852_v11, %v2500_v50 }
 0x23e   : > { %v2428_v26 = vpop.f32.mrf.mxu1  ;;  %v2377_v28 = vpop.f32.mrf.mxu0 }
 0x23f   : > { %v2429_v29 = vadd.f32 %v2428_v26, %v2376_v24  ;;  %v2378_v30 = vadd.f32 %v2377_v28, %v694_v19  ;;  %v2781_v28 = vadd.f32 %v2534_v59, %v2533_v20 }
 0x240   : > { %v2430_v31 = vpop.f32.mrf.mxu1  ;;  %v2379_v33 = vpop.f32.mrf.mxu0 }
 0x241   : > { %3853 = vtanh.f32 %v2429_v29  ;;  %v2431_v35 = vadd.f32 %v2430_v31, %v2378_v30  ;;  %v2380_v37 = vadd.f32 %v2379_v33, %v690_v36 }
 0x242   : > { %v2432_v55 = vpop.f32.mrf.mxu1  ;;  %3855 = vtanh.f32 %v2335_v8  ;;  %v2381_v39 = vpop.f32.mrf.mxu0 }
 0x243   : > { %3857 = vtanh.f32 %v2431_v35  ;;  %v2433_v41 = vadd.f32 %v2432_v55, %v2380_v37  ;;  %v2382_v42 = vadd.f32 %v2381_v39, %v694_v19 }
 0x244   : > { %v2434_v43 = vpop.f32.mrf.mxu1  ;;  %3859 = vtanh.f32 %v2337_v32  ;;  %v2385_v44 = vpop.f32.mrf.mxu0 }
 0x245   : > { %3861 = vtanh.f32 %v2433_v41  ;;  %v2435_v45 = vadd.f32 %v2434_v43, %v2382_v42  ;;  %v2386_v47 = vadd.f32 %v2385_v44, %v690_v36 }
 0x246   : > { %v2438_v49 = vpop.f32.mrf.mxu1  ;;  %3863 = vtanh.f32 %v2339_v38  ;;  %v2387_v52 = vpop.f32.mrf.mxu0 }
 0x247   : > { %3865 = vtanh.f32 %v2435_v45  ;;  %v2439_v46 = vadd.f32 %v2438_v49, %v2386_v47  ;;  %v2388_v53 = vadd.f32 %v2387_v52, %v694_v19  ;;  %v2578_v52 = vand.u32 127, %v663_v48 }
 0x248   : > { %v2440_v63 = vpop.f32.mrf.mxu1  ;;  %v2389_v0 = vpop.f32.mrf.mxu0 }
 0x249   : > { %3867 = vtanh.f32 %v2439_v46  ;;  %v2441_v15 = vadd.f32 %v2440_v63, %v2388_v53  ;;  %v2390_v1 = vadd.f32 %v2389_v0, %v690_v36  ;;  %v2583_v53 = vadd.s32 4294967288, %v2578_v52 }
 0x24a   : > { %v2442_v2 = vpop.f32.mrf.mxu1  ;;  %v2391_v4 = vpop.f32.mrf.mxu0  ;;  %v4692_v12 = vsub.s32 %v2578_v52, %v4619_v51 }
 0x24b   : > { %3869 = vtanh.f32 %v2441_v15  ;;  %v2443_v7 = vadd.f32 %v2442_v2, %v2390_v1  ;;  %v2392_v62 = vadd.f32 %v2391_v4, %v694_v19 }
 0x24c   : > { %v2444_v10 = vpop.f32.mrf.mxu1 }
 0x24d   : > { %3871 = vtanh.f32 %v2443_v7  ;;  %v2445_v13 = vadd.f32 %v2444_v10, %v2392_v62 }
 0x24e   : > { %v3854_v56 = vpop.eup %3853 }
 0x24f   : > { %v3856_v36 = vpop.eup %3855  ;;  %3873 = vtanh.f32 %v2445_v13  ;;  %v2527_v22 = vmul.f32 %v3854_v56, %v2508_v61 }
 0x250   : > { %v3858_v16 = vpop.eup %3857  ;;  %v2542_v24 = vmul.f32 %v3856_v36, %v2504_v60 }
 0x251   : > { %v3860_v17 = vpop.eup %3859  ;;  %v2528_v18 = vmul.f32 %v3858_v16, %v2512_v3  ;;  %v2777_v19 = vadd.f32 %v2776_v14, %v2527_v22 }
 0x252   : > { %v3862_v21 = vpop.eup %3861  ;;  %v2786_v31 = vadd.f32 %v2542_v24, %v2541_v23  ;;  %v2549_v35 = vmul.f32 %v3860_v17, %v2500_v50  ;;  %v4689_v50 = vsub.s32 %v2583_v53, %v4619_v51 }
 0x253   : > { %v3864_v26 = vpop.eup %3863  ;;  %v2778_v8 = vadd.f32 %v2777_v19, %v2528_v18  ;;  %v2535_v27 = vmul.f32 %v3862_v21, %v2508_v61 }
 0x254   : > { %v3866_v29 = vpop.eup %3865  ;;  %v2550_v37 = vmul.f32 %v3864_v26, %v2504_v60 }
 0x255   : > { %2779 = vadd.xlane.f32.xlu0 %v2778_v8  ;;  %v2536_v40 = vmul.f32 %v3866_v29, %v2512_v3  ;;  %v2782_v34 = vadd.f32 %v2781_v28, %v2535_v27 }
 0x256   : > { %v3868_v30 = vpop.eup %3867  ;;  %v2791_v44 = vadd.f32 %v2550_v37, %v2549_v35 }
 0x257   : > { %v2783_v32 = vadd.f32 %v2782_v34, %v2536_v40  ;;  %v2543_v33 = vmul.f32 %v3868_v30, %v2508_v61 }
 0x258   : > { %v3870_v55 = vpop.eup %3869 }
 0x259   : > { %2784 = vadd.xlane.f32.xlu1 %v2783_v32  ;;  %v2544_v38 = vmul.f32 %v3870_v55, %v2512_v3  ;;  %v2787_v39 = vadd.f32 %v2786_v31, %v2543_v33 }
 0x25a   : > { %v3872_v41 = vpop.eup %3871 }
 0x25b   : > { %v2788_v42 = vadd.f32 %v2787_v39, %v2544_v38  ;;  %v2551_v43 = vmul.f32 %v3872_v41, %v2508_v61 }
 0x25c   : > { %v3874_v45 = vpop.eup %3873 }
 0x25d   : > { %2789 = vadd.xlane.f32.xlu0 %v2788_v42  ;;  %v2552_v47 = vmul.f32 %v3874_v45, %v2512_v3  ;;  %v2792_v49 = vadd.f32 %v2791_v44, %v2551_v43 }
 0x25e   : > { %v2557_v46 = vpop.xlane.xlu0 %2556 }
 0x25f   : > { %v2793_v58 = vadd.f32 %v2792_v49, %v2552_v47  ;;  %v2582_v1 = vrot.slane %v2557_v46, %v4692_v12 }
 0x261   : > { %2794 = vadd.xlane.f32.xlu1 %v2793_v58 }
 0x262   : > { %v2562_v60 = vpop.xlane.xlu0 %2561 }
 0x263   : > { %v2587_v0 = vrot.slane %v2562_v60, %v4689_v50 }
 0x265   : > { %v2589_v61 = vsel %vm2588_vm0, %v2587_v0, %v2582_v1 }
 0x266   : > { %v2567_v63 = vpop.xlane.xlu1 %2566 }
 0x267   : > { %v2593_v48 = vrot.slane %v2567_v63, %v4692_v12 }
 0x26a   : > { %v2572_v15 = vpop.xlane.xlu1 %2571 }
 0x26b   : > { %v2597_v2 = vrot.slane %v2572_v15, %v4689_v50 }
 0x26d   : > { %v2598_v4 = vsel %vm2588_vm0, %v2597_v2, %v2593_v48 }
 0x26e   : > { %v2600_v5 = vsel %vm2599_vm1, %v2598_v4, %v2589_v61 }
 0x26f   : > { %v2603_v51 = vsel %vm2602_vm2, %v2600_v5, -inf }
 0x270   : > { %2604 = vmax.xlane.f32.xlu0 %v2603_v51 }
 0x2de   : > { %v2780_v7 = vpop.xlane.xlu0 %2779 }
 0x2df   : > { %v2803_v11 = vrot.slane %v2780_v7, %v4692_v12 }
 0x2e2   : > { %v2785_v62 = vpop.xlane.xlu1 %2784 }
 0x2e3   : > { %v2807_v9 = vrot.slane %v2785_v62, %v4689_v50 }
 0x2e5   : > { %v2808_v56 = vsel %vm2588_vm0, %v2807_v9, %v2803_v11 }
 0x2e6   : > { %v2790_v25 = vpop.xlane.xlu0 %2789 }
 0x2e7   : > { %v2812_v13 = vrot.slane %v2790_v25, %v4692_v12 }
 0x2ea   : > { %v2795_v10 = vpop.xlane.xlu1 %2794 }
 0x2eb   : > { %v2816_v3 = vrot.slane %v2795_v10, %v4689_v50 }
 0x2ed   : > { %v2817_v36 = vsel %vm2588_vm0, %v2816_v3, %v2812_v13 }
 0x2ee   : > { %v2818_v22 = vsel %vm2599_vm1, %v2817_v36, %v2808_v56 }
 0x2ef   : > { %v2820_v14 = vsel %vm2602_vm2, %v2818_v22, -inf }
 0x2f0   : > { %2821 = vmax.xlane.f32.xlu1 %v2820_v14 }
 0x2f9   : > { %v2605_v59 = vpop.xlane.xlu0 %2604 }
 0x2fa   : > { %v2610_v16 = vrot.slane %v2605_v59, %v4627_v54  ;;  %v2614_v17 = vrot.slane %v2605_v59, %v4632_v57  ;;  %v3062_v59 = vld [vmem:[#allocation6 + $0xf8] sm:$0xff] }
 0x2fb   : > { %3171 = vmatprep.subr.mxu0 %v3062_v59  ;;  %v3033_v59 = vld [vmem:[#allocation6 + $0x10] sm:$0xff] }
 0x2fc   : > { %v2617_v18 = vsub.f32 %v2557_v46, %v2610_v16  ;;  %v2618_v19 = vsub.f32 %v2562_v60, %v2610_v16  ;;  %v2619_v20 = vsub.f32 %v2567_v63, %v2614_v17  ;;  %v2620_v24 = vsub.f32 %v2572_v15, %v2614_v17  ;;  %v3126_v16 = vld [vmem:[#allocation6 + $0x2f8] sm:$0xff]  ;;  %v3061_v17 = vld [vmem:[#allocation6 + $0xf0] sm:$0xff] }
 0x2fd   : > { %3242 = vmatprep.subr.mxu1 %v3126_v16  ;;  %3172 = vmatpush1.msra.mxu0 %v3061_v17  ;;  %v3097_v16 = vld [vmem:[#allocation6 + $0x210] sm:$0xff]  ;;  %v3032_v17 = vld [vmem:[#allocation6 + $0x8] sm:$0xff] }
 0x2fe   : > { %v2621_v21 = vmul.f32 1.442695, %v2617_v18  ;;  %v2623_v23 = vmul.f32 1.442695, %v2618_v19  ;;  %v2625_v26 = vmul.f32 1.442695, %v2619_v20 }
 0x2ff   : > { %v2627_v8 = vmul.f32 1.442695, %v2620_v24  ;;  %v3125_v18 = vld [vmem:[#allocation6 + $0x2f0] sm:$0xff]  ;;  %v3060_v19 = vld [vmem:[#allocation6 + $0xe8] sm:$0xff]  ;;  %v3058_v24 = vld [vmem:[#allocation6 + $0xd8] sm:$0xff] }
 0x300   : > { %3875 = vpow2.f32 %v2621_v21  ;;  %v3124_v20 = vld [vmem:[#allocation6 + $0x2e8] sm:$0xff]  ;;  %3243 = vmatpush1.msra.mxu1 %v3125_v18  ;;  %v3059_v21 = vld [vmem:[#allocation6 + $0xe0] sm:$0xff]  ;;  %3173 = vmatprep.subr.mxu0 %v3060_v19 }
 0x301   : > { %3877 = vpow2.f32 %v2623_v23  ;;  %v3123_v23 = vld [vmem:[#allocation6 + $0x2e0] sm:$0xff]  ;;  %3244 = vmatprep.subr.mxu1 %v3124_v20  ;;  %3174 = vmatpush1.msra.mxu0 %v3059_v21  ;;  %v3096_v18 = vld [vmem:[#allocation6 + $0x208] sm:$0xff]  ;;  %v3094_v21 = vld [vmem:[#allocation6 + $0x1f8] sm:$0xff] }
 0x302   : > { %3879 = vpow2.f32 %v2625_v26  ;;  %v3122_v26 = vld [vmem:[#allocation6 + $0x2d8] sm:$0xff]  ;;  %3245 = vmatpush1.msra.mxu1 %v3123_v23  ;;  %3175 = vmatprep.subr.mxu0 %v3058_v24  ;;  %v3031_v19 = vld [vmem:[#allocation6] sm:$0xff]  ;;  %v3093_v24 = vld [vmem:[#allocation6 + $0x1f0] sm:$0xff] }
 0x303   : > { %3881 = vpow2.f32 %v2627_v8  ;;  %v3057_v8 = vld [vmem:[#allocation6 + $0xd0] sm:$0xff]  ;;  %3246 = vmatprep.subr.mxu1 %v3122_v26  ;;  %v3095_v20 = vld [vmem:[#allocation6 + $0x200] sm:$0xff]  ;;  %v3158_v23 = vld [vmem:[#allocation6 + $0x3f8] sm:$0xff] }
 0x304   : > { %3176 = vmatpush1.msra.mxu0 %v3057_v8  ;;  %v3157_v26 = vld [vmem:[#allocation6 + $0x3f0] sm:$0xff]  ;;  %v3092_v8 = vld [vmem:[#allocation6 + $0x1e8] sm:$0xff] }
 0x30d   : > { %v3876_v27 = vpop.eup %3875 }
 0x30e   : > { %v3878_v28 = vpop.eup %3877  ;;  %2634 = vperm.xlu0 %3797, %v3876_v27  }
 0x30f   : > { %2637 = vperm.xlu1 %3798, %v3878_v28   ;;  %v3880_v29 = vpop.eup %3879 }
 0x310   : > { %v3882_v40 = vpop.eup %3881 }
 0x313   : > { %2640 = vperm.xlu1 %3798, %v3880_v29  }
 0x317   : > { %2643 = vperm.xlu1 %3798, %v3882_v40  }
 0x379   : > { %v2822_v34 = vpop.xlane.xlu1 %2821 }
 0x37a   : > { %v2827_v30 = vrot.slane %v2822_v34, %v4627_v54  ;;  %v2831_v31 = vrot.slane %v2822_v34, %v4632_v57  ;;  %v3119_v34 = vld [vmem:[#allocation6 + $0x2c0] sm:$0xff] }
 0x37c   : > { %v2834_v32 = vsub.f32 %v2780_v7, %v2827_v30  ;;  %v2835_v33 = vsub.f32 %v2785_v62, %v2827_v30  ;;  %v2836_v37 = vsub.f32 %v2790_v25, %v2831_v31  ;;  %v2837_v38 = vsub.f32 %v2795_v10, %v2831_v31  ;;  %v3054_v30 = vld [vmem:[#allocation6 + $0xb8] sm:$0xff] }
 0x37d   : > { %v3118_v31 = vld [vmem:[#allocation6 + $0x2b8] sm:$0xff] }
 0x37e   : > { %v2838_v35 = vmul.f32 1.442695, %v2834_v32  ;;  %v2840_v55 = vmul.f32 1.442695, %v2835_v33  ;;  %v2842_v39 = vmul.f32 1.442695, %v2836_v37 }
 0x37f   : > { %v2844_v41 = vmul.f32 1.442695, %v2837_v38  ;;  %v3053_v32 = vld [vmem:[#allocation6 + $0xb0] sm:$0xff]  ;;  %v3116_v37 = vld [vmem:[#allocation6 + $0x2a8] sm:$0xff]  ;;  %v3115_v38 = vld [vmem:[#allocation6 + $0x2a0] sm:$0xff] }
 0x380   : > { %3883 = vpow2.f32 %v2838_v35  ;;  %v3117_v33 = vld [vmem:[#allocation6 + $0x2b0] sm:$0xff]  ;;  %v3052_v35 = vld [vmem:[#allocation6 + $0xa8] sm:$0xff] }
 0x381   : > { %3885 = vpow2.f32 %v2840_v55  ;;  %v3051_v55 = vld [vmem:[#allocation6 + $0xa0] sm:$0xff] }
 0x382   : > { %3887 = vpow2.f32 %v2842_v39  ;;  %v3050_v39 = vld [vmem:[#allocation6 + $0x98] sm:$0xff] }
 0x383   : > { %3889 = vpow2.f32 %v2844_v41  ;;  %v3114_v41 = vld [vmem:[#allocation6 + $0x298] sm:$0xff] }
 0x389   : > { %v2635_v58 = vpop.permute.xlu0 %2634 }
 0x38a   : > { %v2638_v47 = vpop.permute.xlu1 %2637  ;;  %v2648_v60 = vrot.slane %v2635_v58, %v4692_v12  ;;  %v3112_v58 = vld [vmem:[#allocation6 + $0x288] sm:$0xff] }
 0x38b   : > { %v2652_v53 = vrot.slane %v2638_v47, %v4689_v50  ;;  %v3049_v47 = vld [vmem:[#allocation6 + $0x90] sm:$0xff] }
 0x38d   : > { %v4714_v42 = vpop.eup %3883  ;;  %v2653_v15 = vsel %vm2588_vm0, %v2652_v53, %v2648_v60  ;;  %v3111_v53 = vld [vmem:[#allocation6 + $0x280] sm:$0xff]  ;;  %v3046_v60 = vld [vmem:[#allocation6 + $0x78] sm:$0xff] }
 0x38e   : > { %2851 = vperm.xlu1 %3798, %v4714_v42   ;;  %v4717_v43 = vpop.eup %3885  ;;  %v2641_v49 = vpop.permute.xlu1 %2640 }
 0x38f   : > { %v4720_v44 = vpop.eup %3887  ;;  %v2657_v63 = vrot.slane %v2641_v49, %v4692_v12  ;;  %v3113_v49 = vld [vmem:[#allocation6 + $0x290] sm:$0xff] }
 0x390   : > { %v4723_v45 = vpop.eup %3889 }
 0x392   : > { %2854 = vperm.xlu1 %3798, %v4717_v43   ;;  %v2644_v52 = vpop.permute.xlu1 %2643 }
 0x393   : > { %v2661_v46 = vrot.slane %v2644_v52, %v4689_v50  ;;  %v3048_v52 = vld [vmem:[#allocation6 + $0x88] sm:$0xff] }
 0x395   : > { %v2662_v0 = vsel %vm2588_vm0, %v2661_v46, %v2657_v63  ;;  %v3047_v46 = vld [vmem:[#allocation6 + $0x80] sm:$0xff]  ;;  %v3110_v63 = vld [vmem:[#allocation6 + $0x278] sm:$0xff] }
 0x396   : > { %2857 = vperm.xlu1 %3798, %v4720_v44   ;;  %v2663_v1 = vsel %vm2599_vm1, %v2662_v0, %v2653_v15  ;;  %v3045_v0 = vld [vmem:[#allocation6 + $0x70] sm:$0xff] }
 0x397   : > { %v2665_v48 = vsel %vm2602_vm2, %v2663_v1, 0.0  ;;  %v3109_v15 = vld [vmem:[#allocation6 + $0x270] sm:$0xff]  ;;  %v3044_v1 = vld [vmem:[#allocation6 + $0x68] sm:$0xff] }
 0x39a   : > { %2860 = vperm.xlu1 %3798, %v4723_v45  }
 0x3be   : > { %2666 = vadd.xlane.f32.xlu1 %v2665_v48  ;;  %v3108_v48 = vld [vmem:[#allocation6 + $0x268] sm:$0xff] }
 0x409   : > { %v2852_v2 = vpop.permute.xlu1 %2851 }
 0x40a   : > { %v2865_v6 = vrot.slane %v2852_v2, %v4692_v12  ;;  %v3043_v2 = vld [vmem:[#allocation6 + $0x60] sm:$0xff] }
 0x40d   : > { %v2855_v61 = vpop.permute.xlu1 %2854 }
 0x40e   : > { %v2869_v5 = vrot.slane %v2855_v61, %v4689_v50  ;;  %v3107_v61 = vld [vmem:[#allocation6 + $0x260] sm:$0xff] }
 0x410   : > { %v2870_v25 = vsel %vm2588_vm0, %v2869_v5, %v2865_v6  ;;  %v3106_v5 = vld [vmem:[#allocation6 + $0x258] sm:$0xff]  ;;  %v3105_v6 = vld [vmem:[#allocation6 + $0x250] sm:$0xff] }
 0x411   : > { %v2858_v4 = vpop.permute.xlu1 %2857 }
 0x412   : > { %v2874_v7 = vrot.slane %v2858_v4, %v4692_v12  ;;  %v3042_v4 = vld [vmem:[#allocation6 + $0x58] sm:$0xff] }
 0x415   : > { %v2861_v51 = vpop.permute.xlu1 %2860 }
 0x416   : > { %v2878_v62 = vrot.slane %v2861_v51, %v4689_v50  ;;  %v3041_v51 = vld [vmem:[#allocation6 + $0x50] sm:$0xff] }
 0x418   : > { %v2879_v9 = vsel %vm2588_vm0, %v2878_v62, %v2874_v7  ;;  %v3040_v7 = vld [vmem:[#allocation6 + $0x48] sm:$0xff] }
 0x419   : > { %v2880_v10 = vsel %vm2599_vm1, %v2879_v9, %v2870_v25  ;;  %v3104_v62 = vld [vmem:[#allocation6 + $0x248] sm:$0xff]  ;;  %v3039_v25 = vld [vmem:[#allocation6 + $0x40] sm:$0xff] }
 0x41a   : > { %v2882_v11 = vsel %vm2602_vm2, %v2880_v10, 0.0  ;;  %v3103_v9 = vld [vmem:[#allocation6 + $0x240] sm:$0xff]  ;;  %v3038_v10 = vld [vmem:[#allocation6 + $0x38] sm:$0xff] }
 0x41b   : > { %2883 = vadd.xlane.f32.xlu0 %v2882_v11  ;;  %v3102_v11 = vld [vmem:[#allocation6 + $0x238] sm:$0xff] }
 0x447   : > { %v2667_v13 = vpop.xlane.xlu1 %2666 }
 0x448   : > { %3891 = vrcp.f32 %v2667_v13  ;;  %v3037_v13 = vld [vmem:[#allocation6 + $0x30] sm:$0xff] }
 0x455   : > { %v3892_v3 = vpop.eup %3891 }
 0x456   : > { %v2673_v56 = vrot.slane %v3892_v3, %v4627_v54  ;;  %v2677_v12 = vrot.slane %v3892_v3, %v4632_v57  ;;  %v3101_v3 = vld [vmem:[#allocation6 + $0x230] sm:$0xff] }
 0x458   : > { %v2681_v36 = vmul.f32 %v3878_v28, %v2673_v56  ;;  %v2680_v22 = vmul.f32 %v3876_v27, %v2673_v56  ;;  %v2682_v50 = vmul.f32 %v3880_v29, %v2677_v12  ;;  %v2683_v14 = vmul.f32 %v3882_v40, %v2677_v12  ;;  %v3121_v27 = vld [vmem:[#allocation6 + $0x2d0] sm:$0xff]  ;;  %v3056_v28 = vld [vmem:[#allocation6 + $0xc8] sm:$0xff]  ;;  %v3055_v40 = vld [vmem:[#allocation6 + $0xc0] sm:$0xff] }
 0x459   : > { %v3120_v29 = vld [vmem:[#allocation6 + $0x2c8] sm:$0xff]  ;;  %3247 = vmatpush1.msra.mxu1 %v3121_v27  ;;  %3177 = vmatprep.subr.mxu0 %v3056_v28  ;;  %v3099_v12 = vld [vmem:[#allocation6 + $0x220] sm:$0xff] }
 0x45a   : > { %2691 = vperm.xlu1 %3798, %v2681_v36   ;;  %2686 = vperm.xlu0 %3797, %v2680_v22   ;;  %v3036_v56 = vld [vmem:[#allocation6 + $0x28] sm:$0xff]  ;;  %v3035_v22 = vld [vmem:[#allocation6 + $0x20] sm:$0xff] }
 0x45b   : > { %3248 = vmatprep.subr.mxu1 %v3120_v29  ;;  %3178 = vmatpush1.msra.mxu0 %v3055_v40  ;;  %v3100_v36 = vld [vmem:[#allocation6 + $0x228] sm:$0xff]  ;;  %v3091_v28 = vld [vmem:[#allocation6 + $0x1e0] sm:$0xff]  ;;  %v3090_v40 = vld [vmem:[#allocation6 + $0x1d8] sm:$0xff] }
 0x45c   : > { %3249 = vmatpush1.msra.mxu1 %v3119_v34  ;;  %3179 = vmatprep.subr.mxu0 %v3054_v30  ;;  %v3156_v27 = vld [vmem:[#allocation6 + $0x3e8] sm:$0xff]  ;;  %v3155_v29 = vld [vmem:[#allocation6 + $0x3e0] sm:$0xff]  ;;  %v3154_v34 = vld [vmem:[#allocation6 + $0x3d8] sm:$0xff] }
 0x45d   : > { %3250 = vmatprep.subr.mxu1 %v3118_v31  ;;  %3180 = vmatpush1.msra.mxu0 %v3053_v32  ;;  %v3089_v30 = vld [vmem:[#allocation6 + $0x1d0] sm:$0xff]  ;;  %v3088_v32 = vld [vmem:[#allocation6 + $0x1c8] sm:$0xff] }
 0x45e   : > { %2696 = vperm.xlu1 %3798, %v2682_v50   ;;  %2701 = vperm.xlu0 %3797, %v2683_v14   ;;  %v3034_v50 = vld [vmem:[#allocation6 + $0x18] sm:$0xff]  ;;  %v3153_v31 = vld [vmem:[#allocation6 + $0x3d0] sm:$0xff] }
 0x45f   : > { %3251 = vmatpush1.msra.mxu1 %v3117_v33  ;;  %3181 = vmatprep.subr.mxu0 %v3052_v35  ;;  %v3098_v14 = vld [vmem:[#allocation6 + $0x218] sm:$0xff]  ;;  %v3152_v33 = vld [vmem:[#allocation6 + $0x3c8] sm:$0xff]  ;;  %v3087_v35 = vld [vmem:[#allocation6 + $0x1c0] sm:$0xff] }
 0x460   : > { %3252 = vmatprep.subr.mxu1 %v3116_v37  ;;  %3182 = vmatpush1.msra.mxu0 %v3051_v55  ;;  %v3151_v37 = vld [vmem:[#allocation6 + $0x3c0] sm:$0xff]  ;;  %v3086_v55 = vld [vmem:[#allocation6 + $0x1b8] sm:$0xff] }
 0x461   : > { %3253 = vmatpush1.msra.mxu1 %v3115_v38  ;;  %3183 = vmatprep.subr.mxu0 %v3050_v39  ;;  %v3150_v38 = vld [vmem:[#allocation6 + $0x3b8] sm:$0xff] }
 0x462   : > { %3254 = vmatprep.subr.mxu1 %v3114_v41  ;;  %3184 = vmatpush1.msra.mxu0 %v3049_v47 }
 0x463   : > { %3255 = vmatpush1.msra.mxu1 %v3113_v49  ;;  %3185 = vmatprep.subr.mxu0 %v3048_v52 }
 0x464   : > { %3256 = vmatprep.subr.mxu1 %v3112_v58  ;;  %3186 = vmatpush1.msra.mxu0 %v3047_v46  ;;  %v3085_v46 = vld [vmem:[#allocation6 + $0x1b0] sm:$0xff] }
 0x465   : > { %3257 = vmatpush1.msra.mxu1 %v3111_v53  ;;  %3187 = vmatprep.subr.mxu0 %v3046_v60  ;;  %v3149_v53 = vld [vmem:[#allocation6 + $0x3b0] sm:$0xff]  ;;  %v3084_v60 = vld [vmem:[#allocation6 + $0x1a8] sm:$0xff] }
 0x466   : > { %3258 = vmatprep.subr.mxu1 %v3110_v63  ;;  %3188 = vmatpush1.msra.mxu0 %v3045_v0  ;;  %v3148_v63 = vld [vmem:[#allocation6 + $0x3a8] sm:$0xff]  ;;  %v3083_v0 = vld [vmem:[#allocation6 + $0x1a0] sm:$0xff] }
 0x467   : > { %3259 = vmatpush1.msra.mxu1 %v3109_v15  ;;  %3189 = vmatprep.subr.mxu0 %v3044_v1  ;;  %v3147_v15 = vld [vmem:[#allocation6 + $0x3a0] sm:$0xff]  ;;  %v3082_v1 = vld [vmem:[#allocation6 + $0x198] sm:$0xff] }
 0x468   : > { %3260 = vmatprep.subr.mxu1 %v3108_v48  ;;  %3190 = vmatpush1.msra.mxu0 %v3043_v2  ;;  %v3146_v48 = vld [vmem:[#allocation6 + $0x398] sm:$0xff]  ;;  %v3081_v2 = vld [vmem:[#allocation6 + $0x190] sm:$0xff] }
 0x469   : > { %3261 = vmatpush1.msra.mxu1 %v3107_v61  ;;  %3191 = vmatprep.subr.mxu0 %v3042_v4  ;;  %v3145_v61 = vld [vmem:[#allocation6 + $0x390] sm:$0xff]  ;;  %v3080_v4 = vld [vmem:[#allocation6 + $0x188] sm:$0xff] }
 0x46a   : > { %3262 = vmatprep.subr.mxu1 %v3106_v5  ;;  %3192 = vmatpush1.msra.mxu0 %v3041_v51  ;;  %v3144_v5 = vld [vmem:[#allocation6 + $0x388] sm:$0xff]  ;;  %v3079_v51 = vld [vmem:[#allocation6 + $0x180] sm:$0xff] }
 0x46b   : > { %3263 = vmatpush1.msra.mxu1 %v3105_v6  ;;  %3193 = vmatprep.subr.mxu0 %v3040_v7  ;;  %v3143_v6 = vld [vmem:[#allocation6 + $0x380] sm:$0xff]  ;;  %v3078_v7 = vld [vmem:[#allocation6 + $0x178] sm:$0xff] }
 0x46c   : > { %3264 = vmatprep.subr.mxu1 %v3104_v62  ;;  %3194 = vmatpush1.msra.mxu0 %v3039_v25  ;;  %v3142_v62 = vld [vmem:[#allocation6 + $0x378] sm:$0xff]  ;;  %v3076_v25 = vld [vmem:[#allocation6 + $0x168] sm:$0xff] }
 0x46d   : > { %3265 = vmatpush1.msra.mxu1 %v3103_v9  ;;  %3195 = vmatprep.subr.mxu0 %v3038_v10  ;;  %v3140_v9 = vld [vmem:[#allocation6 + $0x368] sm:$0xff]  ;;  %v3075_v10 = vld [vmem:[#allocation6 + $0x160] sm:$0xff] }
 0x46e   : > { %3266 = vmatprep.subr.mxu1 %v3102_v11  ;;  %3196 = vmatpush1.msra.mxu0 %v3037_v13  ;;  %v3139_v11 = vld [vmem:[#allocation6 + $0x360] sm:$0xff]  ;;  %v3074_v13 = vld [vmem:[#allocation6 + $0x158] sm:$0xff] }
 0x46f   : > { %3267 = vmatpush1.msra.mxu1 %v3101_v3  ;;  %3197 = vmatprep.subr.mxu0 %v3036_v56  ;;  %v3138_v3 = vld [vmem:[#allocation6 + $0x358] sm:$0xff]  ;;  %v3073_v56 = vld [vmem:[#allocation6 + $0x150] sm:$0xff] }
 0x470   : > { %3268 = vmatprep.subr.mxu1 %v3100_v36  ;;  %3198 = vmatpush1.msra.mxu0 %v3035_v22  ;;  %v3137_v36 = vld [vmem:[#allocation6 + $0x350] sm:$0xff]  ;;  %v3072_v22 = vld [vmem:[#allocation6 + $0x148] sm:$0xff] }
 0x471   : > { %3269 = vmatpush1.msra.mxu1 %v3099_v12  ;;  %3199 = vmatprep.subr.mxu0 %v3034_v50  ;;  %v3136_v12 = vld [vmem:[#allocation6 + $0x348] sm:$0xff]  ;;  %v3071_v50 = vld [vmem:[#allocation6 + $0x140] sm:$0xff] }
 0x472   : > { %3270 = vmatprep.subr.mxu1 %v3098_v14  ;;  %3200 = vmatpush1.msra.mxu0 %v3033_v59  ;;  %v3135_v14 = vld [vmem:[#allocation6 + $0x340] sm:$0xff]  ;;  %v3070_v59 = vld [vmem:[#allocation6 + $0x138] sm:$0xff] }
 0x473   : > { %3271 = vmatpush1.msra.mxu1 %v3097_v16  ;;  %3201 = vmatprep.subr.mxu0 %v3032_v17  ;;  %v3134_v16 = vld [vmem:[#allocation6 + $0x338] sm:$0xff]  ;;  %v3069_v17 = vld [vmem:[#allocation6 + $0x130] sm:$0xff] }
 0x474   : > { %3272 = vmatprep.subr.mxu1 %v3096_v18  ;;  %3202 = vmatpush1.msra.mxu0 %v3031_v19  ;;  %v3133_v18 = vld [vmem:[#allocation6 + $0x330] sm:$0xff]  ;;  %v3068_v19 = vld [vmem:[#allocation6 + $0x128] sm:$0xff] }
 0x475   : > { %3273 = vmatpush1.msra.mxu1 %v3095_v20  ;;  %3203 = vmatprep.subr.mxu0 %v3094_v21  ;;  %v3132_v20 = vld [vmem:[#allocation6 + $0x328] sm:$0xff]  ;;  %v3067_v21 = vld [vmem:[#allocation6 + $0x120] sm:$0xff] }
 0x476   : > { %3274 = vmatprep.subr.mxu1 %v3158_v23  ;;  %3204 = vmatpush2.msra.mxu0 %v3093_v24  ;;  %v3131_v23 = vld [vmem:[#allocation6 + $0x320] sm:$0xff]  ;;  %v3066_v24 = vld [vmem:[#allocation6 + $0x118] sm:$0xff] }
 0x477   : > { %3275 = vmatpush2.msra.mxu1 %v3157_v26  ;;  %3205 = vmatprep.subr.mxu0 %v3092_v8  ;;  %v3130_v26 = vld [vmem:[#allocation6 + $0x318] sm:$0xff]  ;;  %v3065_v8 = vld [vmem:[#allocation6 + $0x110] sm:$0xff] }
 0x478   : > { %3276 = vmatprep.subr.mxu1 %v3156_v27  ;;  %3206 = vmatpush2.msra.mxu0 %v3091_v28  ;;  %v3129_v27 = vld [vmem:[#allocation6 + $0x310] sm:$0xff]  ;;  %v3064_v28 = vld [vmem:[#allocation6 + $0x108] sm:$0xff] }
 0x479   : > { %3277 = vmatpush2.msra.mxu1 %v3155_v29  ;;  %3207 = vmatprep.subr.mxu0 %v3090_v40  ;;  %v3128_v29 = vld [vmem:[#allocation6 + $0x308] sm:$0xff]  ;;  %v3063_v40 = vld [vmem:[#allocation6 + $0x100] sm:$0xff] }
 0x47a   : > { %3278 = vmatprep.subr.mxu1 %v3154_v34  ;;  %3208 = vmatpush2.msra.mxu0 %v3089_v30  ;;  %v3127_v34 = vld [vmem:[#allocation6 + $0x300] sm:$0xff]  ;;  %v4753_v30 = vld [vmem:[%s4914_s0 + $0x20] sm:$0xff] }
 0x47b   : > { %3279 = vmatpush2.msra.mxu1 %v3153_v31  ;;  %3209 = vmatprep.subr.mxu0 %v3088_v32  ;;  %v4758_v31 = vld [vmem:[%s4914_s0 + $0x28] sm:$0xff] }
 0x47c   : > { %3280 = vmatprep.subr.mxu1 %v3152_v33  ;;  %3210 = vmatpush2.msra.mxu0 %v3087_v35  ;;  %v4763_v33 = vld [vmem:[%s4914_s0 + $0x30] sm:$0xff]  ;;  %v4768_v35 = vld [vmem:[%s4914_s0 + $0x38] sm:$0xff] }
 0x47d   : > { %3281 = vmatpush2.msra.mxu1 %v3151_v37  ;;  %3211 = vmatprep.subr.mxu0 %v3086_v55  ;;  %v4773_v37 = vld [vmem:[%s4914_s0] sm:$0xff] }
 0x47e   : > { %3282 = vmatprep.subr.mxu1 %v3150_v38  ;;  %3212 = vmatpush2.msra.mxu0 %v3085_v46  ;;  %v4778_v38 = vld [vmem:[%s4914_s0 + $0x8] sm:$0xff] }
 0x47f   : > { %3283 = vmatpush2.msra.mxu1 %v3149_v53  ;;  %3213 = vmatprep.subr.mxu0 %v3084_v60 }
 0x480   : > { %3284 = vmatprep.subr.mxu1 %v3148_v63  ;;  %3214 = vmatpush2.msra.mxu0 %v3083_v0 }
 0x481   : > { %3285 = vmatpush2.msra.mxu1 %v3147_v15  ;;  %3215 = vmatprep.subr.mxu0 %v3082_v1 }
 0x482   : > { %3286 = vmatprep.subr.mxu1 %v3146_v48  ;;  %3216 = vmatpush2.msra.mxu0 %v3081_v2  ;;  %v4811_v2 = vld [vmem:[%s4914_s0 + $0x50] sm:$0xff] }
 0x483   : > { %3287 = vmatpush2.msra.mxu1 %v3145_v61  ;;  %3217 = vmatprep.subr.mxu0 %v3080_v4  ;;  %v4816_v4 = vld [vmem:[%s4914_s0 + $0x58] sm:$0xff] }
 0x484   : > { %3288 = vmatprep.subr.mxu1 %v3144_v5  ;;  %3218 = vmatpush2.msra.mxu0 %v3079_v51  ;;  %v4821_v5 = vld [vmem:[%s4914_s0 + $0x60] sm:$0xff]  ;;  %v4826_v51 = vld [vmem:[%s4914_s0 + $0x68] sm:$0xff] }
 0x485   : > { %3289 = vmatpush2.msra.mxu1 %v3143_v6  ;;  %3219 = vmatprep.subr.mxu0 %v3078_v7 }
 0x486   : > { %3290 = vmatprep.subr.mxu1 %v3142_v62 }
 0x4a4   : > { %v2884_v39 = vpop.xlane.xlu0 %2883 }
 0x4a5   : > { %3893 = vrcp.f32 %v2884_v39  ;;  %v4783_v39 = vld [vmem:[%s4914_s0 + $0x10] sm:$0xff] }
 0x4b2   : > { %v3894_v41 = vpop.eup %3893 }
 0x4b3   : > { %v2890_v47 = vrot.slane %v3894_v41, %v4627_v54  ;;  %v2894_v58 = vrot.slane %v3894_v41, %v4632_v57  ;;  %v4788_v41 = vld [vmem:[%s4914_s0 + $0x18] sm:$0xff] }
 0x4b5   : > { %v2898_v49 = vmul.f32 %v4717_v43, %v2890_v47  ;;  %v2897_v52 = vmul.f32 %v4714_v42, %v2890_v47  ;;  %v2900_v43 = vmul.f32 %v4723_v45, %v2894_v58  ;;  %v2899_v42 = vmul.f32 %v4720_v44, %v2894_v58  ;;  %v3077_v45 = vld [vmem:[#allocation6 + $0x170] sm:$0xff] }
 0x4b6   : > { %v3141_v44 = vld [vmem:[#allocation6 + $0x370] sm:$0xff]  ;;  %3220 = vmatpush2.msra.mxu0 %v3077_v45 }
 0x4b7   : > { %2908 = vperm.xlu0 %3797, %v2898_v49   ;;  %2903 = vperm.xlu1 %3798, %v2897_v52  }
 0x4b8   : > { %3291 = vmatpush2.msra.mxu1 %v3141_v44  ;;  %3221 = vmatprep.subr.mxu0 %v3076_v25  ;;  %v4831_v25 = vld [vmem:[%s4914_s0 + $0x70] sm:$0xff] }
 0x4b9   : > { %3292 = vmatprep.subr.mxu1 %v3140_v9  ;;  %3222 = vmatpush2.msra.mxu0 %v3075_v10  ;;  %v4836_v9 = vld [vmem:[%s4914_s0 + $0x78] sm:$0xff] }
 0x4ba   : > { %3293 = vmatpush2.msra.mxu1 %v3139_v11  ;;  %3223 = vmatprep.subr.mxu0 %v3074_v13 }
 0x4bb   : > { %2918 = vperm.xlu0 %3797, %v2900_v43   ;;  %2913 = vperm.xlu1 %3798, %v2899_v42   ;;  %v4801_v43 = vld [vmem:[%s4914_s0 + $0x40] sm:$0xff]  ;;  %v4806_v42 = vld [vmem:[%s4914_s0 + $0x48] sm:$0xff] }
 0x4bc   : > { %3294 = vmatprep.subr.mxu1 %v3138_v3  ;;  %3224 = vmatpush2.msra.mxu0 %v3073_v56 }
 0x4bd   : > { %3295 = vmatpush2.msra.mxu1 %v3137_v36  ;;  %3225 = vmatprep.subr.mxu0 %v3072_v22 }
 0x4be   : > { %3296 = vmatprep.subr.mxu1 %v3136_v12  ;;  %3226 = vmatpush2.msra.mxu0 %v3071_v50 }
 0x4bf   : > { %3297 = vmatpush2.msra.mxu1 %v3135_v14  ;;  %3227 = vmatprep.subr.mxu0 %v3070_v59 }
 0x4c0   : > { %3298 = vmatprep.subr.mxu1 %v3134_v16  ;;  %3228 = vmatpush2.msra.mxu0 %v3069_v17 }
 0x4c1   : > { %3299 = vmatpush2.msra.mxu1 %v3133_v18  ;;  %3229 = vmatprep.subr.mxu0 %v3068_v19 }
 0x4c2   : > { %3300 = vmatprep.subr.mxu1 %v3132_v20  ;;  %3230 = vmatpush2.msra.mxu0 %v3067_v21 }
 0x4c3   : > { %3301 = vmatpush2.msra.mxu1 %v3131_v23  ;;  %3231 = vmatprep.subr.mxu0 %v3066_v24 }
 0x4c4   : > { %3302 = vmatprep.subr.mxu1 %v3130_v26  ;;  %3232 = vmatpush2.msra.mxu0 %v3065_v8 }
 0x4c5   : > { %3303 = vmatpush2.msra.mxu1 %v3129_v27  ;;  %3233 = vmatprep.subr.mxu0 %v3064_v28 }
 0x4c6   : > { %3304 = vmatprep.subr.mxu1 %v3128_v29  ;;  %3234 = vmatpush2.msra.mxu0 %v3063_v40 }
 0x4c7   : > { %3305 = vmatpush2.msra.mxu1 %v3127_v34 }
 0x4d5   : > { %v2692_v32 = vpop.permute.xlu1 %2691  ;;  %v2687_v55 = vpop.permute.xlu0 %2686 }
 0x4d6   : > { %v2708_v47 = vmul.f32 %v2692_v32, %v4753_v30  ;;  %v2709_v49 = vmul.f32 %v2692_v32, %v4758_v31  ;;  %v2710_v52 = vmul.f32 %v2692_v32, %v4763_v33  ;;  %v2711_v58 = vmul.f32 %v2692_v32, %v4768_v35 }
 0x4d7   : > { %v2704_v46 = vmul.f32 %v2687_v55, %v4773_v37  ;;  %v2705_v53 = vmul.f32 %v2687_v55, %v4778_v38  ;;  %v2706_v60 = vmul.f32 %v2687_v55, %v4783_v39  ;;  %v2707_v63 = vmul.f32 %v2687_v55, %v4788_v41 }
 0x4d9   : > { %v2720_v0 = vadd.f32 %v2708_v47, %v2704_v46  ;;  %v2727_v15 = vadd.f32 %v2709_v49, %v2705_v53  ;;  %v2734_v1 = vadd.f32 %v2710_v52, %v2706_v60  ;;  %v2741_v48 = vadd.f32 %v2711_v58, %v2707_v63  ;;  %v2697_v61 = vpop.permute.xlu1 %2696  ;;  %v2702_v44 = vpop.permute.xlu0 %2701 }
 0x4da   : > { %v2712_v10 = vmul.f32 %v2697_v61, %v4801_v43  ;;  %v2713_v11 = vmul.f32 %v2697_v61, %v4806_v42  ;;  %v2714_v13 = vmul.f32 %v2697_v61, %v4811_v2  ;;  %v2715_v3 = vmul.f32 %v2697_v61, %v4816_v4 }
 0x4db   : > { %v2721_v6 = vrot.slane %v2720_v0, 4  ;;  %v2728_v7 = vrot.slane %v2727_v15, 4  ;;  %v2735_v62 = vrot.slane %v2734_v1, 4  ;;  %v2742_v45 = vrot.slane %v2741_v48, 4 }
 0x4dc   : > { %v2716_v56 = vmul.f32 %v2702_v44, %v4821_v5  ;;  %v2717_v36 = vmul.f32 %v2702_v44, %v4826_v51  ;;  %v2718_v22 = vmul.f32 %v2702_v44, %v4831_v25  ;;  %v2719_v12 = vmul.f32 %v2702_v44, %v4836_v9 }
 0x4dd   : > { %v2722_v50 = vadd.f32 %v2721_v6, %v2720_v0  ;;  %v2729_v14 = vadd.f32 %v2728_v7, %v2727_v15  ;;  %v2736_v59 = vadd.f32 %v2735_v62, %v2734_v1  ;;  %v2743_v16 = vadd.f32 %v2742_v45, %v2741_v48 }
 0x4de   : > { %v2748_v17 = vadd.f32 %v2716_v56, %v2712_v10  ;;  %v2755_v18 = vadd.f32 %v2717_v36, %v2713_v11  ;;  %v2762_v19 = vadd.f32 %v2718_v22, %v2714_v13  ;;  %v2769_v20 = vadd.f32 %v2719_v12, %v2715_v3 }
 0x4df   : > { %v2723_v21 = vrot.slane %v2722_v50, 2  ;;  %v2730_v23 = vrot.slane %v2729_v14, 2  ;;  %v2737_v24 = vrot.slane %v2736_v59, 2  ;;  %v2744_v26 = vrot.slane %v2743_v16, 2 }
 0x4e0   : > { %v2749_v8 = vrot.slane %v2748_v17, 4  ;;  %v2756_v27 = vrot.slane %v2755_v18, 4  ;;  %v2763_v28 = vrot.slane %v2762_v19, 4  ;;  %v2770_v29 = vrot.slane %v2769_v20, 4 }
 0x4e1   : > { %v2724_v40 = vadd.f32 %v2723_v21, %v2722_v50  ;;  %v2738_v34 = vadd.f32 %v2737_v24, %v2736_v59  ;;  %v2731_v32 = vadd.f32 %v2730_v23, %v2729_v14  ;;  %v2745_v55 = vadd.f32 %v2744_v26, %v2743_v16 }
 0x4e2   : > { %v2750_v47 = vadd.f32 %v2749_v8, %v2748_v17  ;;  %v2757_v49 = vadd.f32 %v2756_v27, %v2755_v18  ;;  %v2764_v52 = vadd.f32 %v2763_v28, %v2762_v19  ;;  %v2771_v58 = vadd.f32 %v2770_v29, %v2769_v20 }
 0x4e3   : > { %v2725_v46 = vrot.slane %v2724_v40, 1  ;;  %v2739_v53 = vrot.slane %v2738_v34, 1  ;;  %v2732_v60 = vrot.slane %v2731_v32, 1  ;;  %v2746_v63 = vrot.slane %v2745_v55, 1 }
 0x4e4   : > { %v2751_v0 = vrot.slane %v2750_v47, 2  ;;  %v2758_v15 = vrot.slane %v2757_v49, 2  ;;  %v2765_v1 = vrot.slane %v2764_v52, 2  ;;  %v2772_v48 = vrot.slane %v2771_v58, 2 }
 0x4e5   : > { %v4846_v7 = vadd.f32 %v2732_v60, %v2731_v32  ;;  %v4848_v62 = vadd.f32 %v2746_v63, %v2745_v55  ;;  %v4850_v45 = vadd.f32 %v2725_v46, %v2724_v40  ;;  %v4852_v44 = vadd.f32 %v2739_v53, %v2738_v34 }
 0x4e6   : > { %v4862_v50 = vadd.f32 %v2751_v0, %v2750_v47  ;;  %v4864_v14 = vadd.f32 %v2765_v1, %v2764_v52  ;;  %v2759_v59 = vadd.f32 %v2758_v15, %v2757_v49 }
 0x4e8   : > { %v2753_v1 = vrot.slane %v4862_v50, 1 }
 0x532   : > { %v2904_v61 = vpop.permute.xlu1 %2903  ;;  %v2909_v6 = vpop.permute.xlu0 %2908 }
 0x533   : > { %v2921_v10 = vmul.f32 %v2904_v61, %v4773_v37  ;;  %v2922_v11 = vmul.f32 %v2904_v61, %v4778_v38  ;;  %v2923_v13 = vmul.f32 %v2904_v61, %v4783_v39  ;;  %v2924_v3 = vmul.f32 %v2904_v61, %v4788_v41 }
 0x534   : > { %v2925_v56 = vmul.f32 %v2909_v6, %v4753_v30  ;;  %v2926_v36 = vmul.f32 %v2909_v6, %v4758_v31  ;;  %v2927_v22 = vmul.f32 %v2909_v6, %v4763_v33  ;;  %v2928_v12 = vmul.f32 %v2909_v6, %v4768_v35 }
 0x535   : > { %v2773_v37 = vadd.f32 %v2772_v48, %v2771_v58  ;;  %v2767_v48 = vrot.slane %v4864_v14, 1  ;;  %v2760_v61 = vrot.slane %v2759_v59, 1 }
 0x536   : > { %v2937_v16 = vadd.f32 %v2925_v56, %v2921_v10  ;;  %v2944_v38 = vadd.f32 %v2926_v36, %v2922_v11  ;;  %v2951_v17 = vadd.f32 %v2927_v22, %v2923_v13  ;;  %v2958_v39 = vadd.f32 %v2928_v12, %v2924_v3  ;;  %v2914_v18 = vpop.permute.xlu1 %2913  ;;  %v2919_v41 = vpop.permute.xlu0 %2918 }
 0x537   : > { %v2929_v30 = vmul.f32 %v2914_v18, %v4801_v43  ;;  %v2930_v31 = vmul.f32 %v2914_v18, %v4806_v42  ;;  %v2931_v33 = vmul.f32 %v2914_v18, %v4811_v2  ;;  %v2932_v35 = vmul.f32 %v2914_v18, %v4816_v4 }
 0x538   : > { %v2938_v19 = vrot.slane %v2937_v16, 4  ;;  %v2945_v20 = vrot.slane %v2944_v38, 4  ;;  %v2952_v21 = vrot.slane %v2951_v17, 4  ;;  %v2959_v23 = vrot.slane %v2958_v39, 4 }
 0x539   : > { %v2933_v24 = vmul.f32 %v2919_v41, %v4821_v5  ;;  %v2934_v26 = vmul.f32 %v2919_v41, %v4826_v51  ;;  %v2935_v8 = vmul.f32 %v2919_v41, %v4831_v25  ;;  %v2936_v27 = vmul.f32 %v2919_v41, %v4836_v9 }
 0x53a   : > { %v2939_v28 = vadd.f32 %v2938_v19, %v2937_v16  ;;  %v2946_v43 = vadd.f32 %v2945_v20, %v2944_v38  ;;  %v2953_v29 = vadd.f32 %v2952_v21, %v2951_v17  ;;  %v2960_v42 = vadd.f32 %v2959_v23, %v2958_v39 }
 0x53b   : > { %v2965_v40 = vadd.f32 %v2933_v24, %v2929_v30  ;;  %v2972_v2 = vadd.f32 %v2934_v26, %v2930_v31  ;;  %v2979_v34 = vadd.f32 %v2935_v8, %v2931_v33  ;;  %v2986_v4 = vadd.f32 %v2936_v27, %v2932_v35 }
 0x53c   : > { %v2940_v32 = vrot.slane %v2939_v28, 2  ;;  %v2947_v55 = vrot.slane %v2946_v43, 2  ;;  %v2954_v47 = vrot.slane %v2953_v29, 2  ;;  %v2961_v49 = vrot.slane %v2960_v42, 2 }
 0x53d   : > { %v2966_v52 = vrot.slane %v2965_v40, 4  ;;  %v2973_v5 = vrot.slane %v2972_v2, 4  ;;  %v2980_v58 = vrot.slane %v2979_v34, 4  ;;  %v2987_v51 = vrot.slane %v2986_v4, 4 }
 0x53e   : > { %v2941_v46 = vadd.f32 %v2940_v32, %v2939_v28  ;;  %v2955_v25 = vadd.f32 %v2954_v47, %v2953_v29  ;;  %v2948_v53 = vadd.f32 %v2947_v55, %v2946_v43  ;;  %v2962_v9 = vadd.f32 %v2961_v49, %v2960_v42 }
 0x53f   : > { %v2967_v60 = vadd.f32 %v2966_v52, %v2965_v40  ;;  %v2974_v63 = vadd.f32 %v2973_v5, %v2972_v2  ;;  %v2981_v0 = vadd.f32 %v2980_v58, %v2979_v34  ;;  %v2988_v15 = vadd.f32 %v2987_v51, %v2986_v4 }
 0x540   : > { %v2774_v6 = vrot.slane %v2773_v37, 1  ;;  %v2942_v56 = vrot.slane %v2941_v46, 1  ;;  %v2956_v36 = vrot.slane %v2955_v25, 1  ;;  %v2949_v22 = vrot.slane %v2948_v53, 1 }
 0x541   : > { %v2968_v10 = vrot.slane %v2967_v60, 2  ;;  %v2975_v11 = vrot.slane %v2974_v63, 2  ;;  %v2982_v13 = vrot.slane %v2981_v0, 2  ;;  %v2989_v3 = vrot.slane %v2988_v15, 2 }
 0x542   : > { %v2963_v12 = vrot.slane %v2962_v9, 1  ;;  %v2761_v18 = vadd.f32 %v2760_v61, %v2759_v59  ;;  %v2775_v41 = vadd.f32 %v2774_v6, %v2773_v37  ;;  %v2754_v30 = vadd.f32 %v2753_v1, %v4862_v50 }
 0x543   : > { %v2969_v16 = vadd.f32 %v2968_v10, %v2967_v60  ;;  %v2976_v38 = vadd.f32 %v2975_v11, %v2974_v63  ;;  %v2983_v17 = vadd.f32 %v2982_v13, %v2981_v0  ;;  %v2990_v39 = vadd.f32 %v2989_v3, %v2988_v15 }
 0x544   : > { %v2768_v31 = vadd.f32 %v2767_v48, %v4864_v14  ;;  %v2950_v21 = vadd.f32 %v2949_v22, %v2948_v53  ;;  %v2964_v23 = vadd.f32 %v2963_v12, %v2962_v9  ;;  %v2943_v24 = vadd.f32 %v2942_v56, %v2941_v46 }
 0x545   : > { %v2970_v33 = vrot.slane %v2969_v16, 1  ;;  %v2984_v35 = vrot.slane %v2983_v17, 1  ;;  %v2977_v19 = vrot.slane %v2976_v38, 1  ;;  %v2991_v20 = vrot.slane %v2990_v39, 1 }
 0x546   : > { %v2957_v26 = vadd.f32 %v2956_v36, %v2955_v25  ;;  %v3002_v59 = vsel %vm2599_vm1, %v2761_v18, %v4846_v7  ;;  %v3004_v50 = vsel %vm2599_vm1, %v2775_v41, %v4848_v62  ;;  %v3001_v14 = vsel %vm2599_vm1, %v2754_v30, %v4850_v45  ;;  %v3159_v45 = vld [vmem:[#allocation7] sm:$0x3] }
 0x547   : > { %v2971_v8 = vadd.f32 %v2970_v33, %v2969_v16  ;;  %v2985_v27 = vadd.f32 %v2984_v35, %v2983_v17  ;;  %v2978_v28 = vadd.f32 %v2977_v19, %v2976_v38  ;;  %v2992_v43 = vadd.f32 %v2991_v20, %v2990_v39 }
 0x548   : > { %v3003_v37 = vsel %vm2599_vm1, %v2768_v31, %v4852_v44  ;;  %v3164_v44 = vrot.slane %v3159_v45, %v4627_v54  ;;  %v3168_v32 = vrot.slane %v3159_v45, %v4632_v57 }
 0x549   : > { %v3019_v29 = vsel %vm3017_vm3, %v2978_v28, %v2950_v21  ;;  %v3021_v42 = vsel %vm3017_vm3, %v2992_v43, %v2964_v23  ;;  %v3018_v40 = vsel %vm3017_vm3, %v2971_v8, %v2943_v24  ;;  %v3020_v2 = vsel %vm3017_vm3, %v2985_v27, %v2957_v26 }
 0x54a   : > { %v3028_v34 = vsel %vm3026_vm4, %v3002_v59, %v3019_v29  ;;  %v3030_v7 = vsel %vm3026_vm4, %v3004_v50, %v3021_v42  ;;  %v3027_v62 = vsel %vm3026_vm4, %v3001_v14, %v3018_v40  ;;  %v3029_v4 = vsel %vm3026_vm4, %v3003_v37, %v3020_v2 }
 0x54b   : > { %3235 = vmatprep.mubr.f32.mxu0 %v3028_v34  ;;  %3306 = vmatprep.mubr.f32.mxu1 %v3030_v7 }
 0x54c   : > { %3236 = vmatmul.mubr.f32.vlgmr.msra.gmra.mxu0 %v3027_v62  ;;  %3307 = vmatmul.mubr.f32.vlgmr.msra.gmra.mxu1 %v3029_v4 }
 0x60c   : > { %v3237_v55 = vpop.f32.mrf.mxu0  ;;  %v3308_v47 = vpop.f32.mrf.mxu1 }
 0x60d   : > { %v3238_v49 = vadd.f32 %v3237_v55, %v3164_v44 }
 0x60e   : > { %v3239_v52 = vpop.f32.mrf.mxu0  ;;  %v3310_v58 = vpop.f32.mrf.mxu1 }
 0x60f   : > { %v3240_v5 = vadd.f32 %v3239_v52, %v3168_v32  ;;  %v3309_v51 = vadd.f32 %v3308_v47, %v3238_v49 }
 0x611   : > { %v3311_v46 = vadd.f32 %v3310_v58, %v3240_v5 }
 0x613   : > { %v3315_v25 = vcombine.low %v3309_v51, %v3311_v46 }
 0x615   : > { %3317 = vst [vmem:[%s380_s14] sm:$0xff] %v3315_v25 }
 0x616 PF: > { %s4942_s13 = sld [smem:[#allocation13_spill]]  ;;  %p21_p0 = scmp.ge.s32.totalorder %s4170_s21, 4  }
 0x617   : > { %s4943_s24 = smov %s4049_s25  ;;  %s4944_s25 = smov %s4053_s26 }
 0x618   : > { %s4946_s27 = smov %s4170_s21  ;;  %23 = sbr.rel (!%p21_p0) target bundleno = 10 (0xa), region = 112 }
 0x61c   : > { %s4945_s26 = smov %s4942_s13 }
 0x61d   :  { %3339 = vsyncpa [#allocation3], 1 }
 0x61e   :  { %3341 = vsyncpa [#allocation3 + $0x1], 1 }
 0x61f   :  { %3342 = vsyncpa [#allocation5], 1 }
 0x620   :  { %3344 = vsyncpa [#allocation5 + $0x1], 1 }
 0x621   :  { %3345 = vsyncpa [#allocation8], 1 }

</bundles_post_ra>
